<compile_context>
chip_gen: v5e
topology: v5e:2x2
jax: 0.10.0
libtpu: 0.0.40
codegen_flags: <defaults>
</compile_context>

<pallas_src>
import functools
import math

import jax
import jax.numpy as jnp
import numpy as np
from jax.experimental import pallas as pl
from jax.experimental.pallas import tpu as pltpu


def bilstm_fused_kernel(x_ref, wx_ref, bx_ref, whhf_ref, whhb_ref,
                        wf_ref, wb_ref, blin_ref, y_ref,
                        gx_ref, seqf_ref, seqb_ref, *, T, BC, H):
    """One batch chunk: prologue gx matmul, T-step recurrence, fused Linear."""
    H3 = 3 * H
    H4 = 4 * H

    # ---- prologue: input->gate matmul for BOTH directions over all T at once
    #      (M = T*BC), bias folded in once, stored bf16 in resident VMEM. ----
    gx = jnp.dot(x_ref[...], wx_ref[...], preferred_element_type=jnp.float32)
    gx_ref[...] = (gx + bx_ref[...]).astype(gx_ref.dtype)

    whhf = whhf_ref[...]            # (H, 4H) bf16, hoisted out of the loop
    whhb = whhb_ref[...]

    def cell(gates, c_prev):
        # gate order (i, f, o, g): one wide sigmoid + one tanh (f32 math)
        sig = jax.nn.sigmoid(gates[:, :H3])
        g = jnp.tanh(gates[:, H3:])
        i = sig[:, :H]
        f = sig[:, H:2 * H]
        o = sig[:, 2 * H:]
        c_new = f * c_prev + i * g
        h_new = o * jnp.tanh(c_new)
        return h_new, c_new

    def step(t, carry):
        h_f, c_f, h_b, c_b = carry                       # each (BC, H) f32

        # two small independent recurrent matmuls (no concat, no zero K-work)
        rec_f = jnp.dot(h_f.astype(whhf.dtype), whhf,
                        preferred_element_type=jnp.float32)   # (BC, 4H)
        rec_b = jnp.dot(h_b.astype(whhb.dtype), whhb,
                        preferred_element_type=jnp.float32)

        row_f = pl.multiple_of(t * BC, BC)               # forward : time t
        row_b = pl.multiple_of((T - 1 - t) * BC, BC)     # backward: time T-1-t

        # load only the direction's half of gx, cast up for f32 gate math
        a_f = gx_ref[pl.ds(row_f, BC), :H4].astype(jnp.float32)
        a_b = gx_ref[pl.ds(row_b, BC), H4:].astype(jnp.float32)

        h_f, c_f = cell(a_f + rec_f, c_f)
        h_b, c_b = cell(a_b + rec_b, c_b)

        # accumulate hidden sequences in resident VMEM (bulk writeback later)
        seqf_ref[pl.ds(row_f, BC), :] = h_f.astype(seqf_ref.dtype)
        seqb_ref[pl.ds(row_b, BC), :] = h_b.astype(seqb_ref.dtype)

        return (h_f, c_f, h_b, c_b)

    z = jnp.zeros((BC, H), jnp.float32)
    jax.lax.fori_loop(0, T, step, (z, z, z, z), unroll=8)

    # ---- epilogue: fused nn.Linear on [fwd | bwd] as two bulk matmuls into a
    #      lane-dense (column-padded) output slab. ----
    y = (jnp.dot(seqf_ref[...], wf_ref[...], preferred_element_type=jnp.float32)
         + jnp.dot(seqb_ref[...], wb_ref[...], preferred_element_type=jnp.float32)
         + blin_ref[...])
    y_ref[...] = y.astype(y_ref.dtype)


def _repack_ifog(w):
    """PyTorch gate-row order (i, f, g, o) -> (i, f, o, g)."""
    i_, f_, g_, o_ = jnp.split(w, 4, axis=0)
    return jnp.concatenate([i_, f_, o_, g_], axis=0)


def bidirectional_lstm(x, params, hidden, output_size):
    B, T, I = x.shape
    H = hidden
    O = output_size

    # ---- batch padding / chunking -------------------------------------------
    Bp = ((B + 7) // 8) * 8                 # pad batch to 8-sublane multiple
    BC = math.gcd(Bp, 128)                  # batch-chunk rows per grid step
    nchunks = Bp // BC
    Op = ((O + 127) // 128) * 128           # lane-dense output columns

    # time-major, padded, then regrouped so each batch chunk is one contiguous
    # (T*BC, I) 2D slab -> kernel stays fully 2D (no in-kernel reshapes).
    x_tm = jnp.transpose(x, (1, 0, 2)).astype(jnp.float32)       # (T, B, I)
    if Bp != B:
        x_tm = jnp.pad(x_tm, ((0, 0), (0, Bp - B), (0, 0)))
    x_ck = (x_tm.reshape(T, nchunks, BC, I)
                .transpose(1, 0, 2, 3)
                .reshape(nchunks, T * BC, I)
                .astype(jnp.bfloat16))                           # (nc, T*BC, I)

    # ---- weights: gate order (i, f, o, g), direction-major [fwd 4H | bwd 4H]
    wx = jnp.concatenate([_repack_ifog(params["wih_f"]).T,
                          _repack_ifog(params["wih_b"]).T],
                         axis=1).astype(jnp.bfloat16)            # (I, 8H)
    bx = jnp.concatenate([_repack_ifog(params["bih_f"] + params["bhh_f"]),
                          _repack_ifog(params["bih_b"] + params["bhh_b"])]
                         ).reshape(1, 8 * H).astype(jnp.float32)

    whhf = _repack_ifog(params["whh_f"]).T.astype(jnp.bfloat16)  # (H, 4H)
    whhb = _repack_ifog(params["whh_b"]).T.astype(jnp.bfloat16)  # (H, 4H)

    # output projection split into fwd/bwd halves, columns zero-padded to Op
    wf = jnp.pad(params["w_lin"][:, :H].T, ((0, 0), (0, Op - O))
                 ).astype(jnp.bfloat16)                          # (H, Op)
    wb = jnp.pad(params["w_lin"][:, H:].T, ((0, 0), (0, Op - O))
                 ).astype(jnp.bfloat16)                          # (H, Op)
    blin = jnp.pad(params["b_lin"], (0, Op - O)
                   ).reshape(1, Op).astype(jnp.float32)

    # ---- VMEM budget ---------------------------------------------------------
    vmem_need = (
        2 * T * BC * I * 2                       # x block (double-buffered)
        + 2 * T * BC * Op * 4                    # y block (double-buffered)
        + T * BC * 8 * H * 2                     # gx scratch (bf16)
        + 2 * T * BC * H * 2                     # seq scratch (bf16)
        + T * BC * 8 * H * 4                     # prologue f32 temp
        + T * BC * Op * 4                        # epilogue f32 temp
        + (I * 8 * H + 2 * H * 4 * H + 2 * H * Op) * 2 * 2   # weights
        + (8 * H + Op) * 4
    )
    vmem_limit = int(min(128 * 1024 * 1024,
                         max(2 * vmem_need, 32 * 1024 * 1024)))

    grid_spec = pltpu.PrefetchScalarGridSpec(
        num_scalar_prefetch=0,
        grid=(nchunks,),
        in_specs=[
            pl.BlockSpec((None, T * BC, I), lambda b: (b, 0, 0)),   # x chunk
            pl.BlockSpec((I, 8 * H), lambda b: (0, 0)),             # wx
            pl.BlockSpec((1, 8 * H), lambda b: (0, 0)),             # bx
            pl.BlockSpec((H, 4 * H), lambda b: (0, 0)),             # whh fwd
            pl.BlockSpec((H, 4 * H), lambda b: (0, 0)),             # whh bwd
            pl.BlockSpec((H, Op), lambda b: (0, 0)),                # wf
            pl.BlockSpec((H, Op), lambda b: (0, 0)),                # wb
            pl.BlockSpec((1, Op), lambda b: (0, 0)),                # blin
        ],
        out_specs=pl.BlockSpec((None, T * BC, Op), lambda b: (b, 0, 0)),
        scratch_shapes=[
            pltpu.VMEM((T * BC, 8 * H), jnp.bfloat16),   # gx (input->gate)
            pltpu.VMEM((T * BC, H), jnp.bfloat16),       # forward hidden seq
            pltpu.VMEM((T * BC, H), jnp.bfloat16),       # backward hidden seq
        ],
    )

    y_ck = pl.pallas_call(
        functools.partial(bilstm_fused_kernel, T=T, BC=BC, H=H),
        out_shape=jax.ShapeDtypeStruct((nchunks, T * BC, Op), jnp.float32),
        grid_spec=grid_spec,
        compiler_params=pltpu.CompilerParams(
            dimension_semantics=("parallel",),
            vmem_limit_bytes=vmem_limit,
        ),
    )(x_ck, wx, bx, whhf, whhb, wf, wb, blin)

    # undo chunking / padding
    y = (y_ck.reshape(nchunks, T, BC, Op)
             .transpose(1, 0, 2, 3)
             .reshape(T, Bp, Op))[:, :B, :O]                     # (T, B, O)
    return jnp.transpose(y, (1, 0, 2))                           # (B, T, O)


# --------------------------------------------------------------------------
# Pure-JAX reference (PyTorch LSTM semantics) for verification
# --------------------------------------------------------------------------
def reference(x, params, H):
    B, T, I = x.shape
    x_tm = jnp.transpose(x, (1, 0, 2))

    def run_dir(x_seq, wih, whh, bih, bhh):
        def step(carry, xt):
            h, c = carry
            g = xt @ wih.T + h @ whh.T + bih + bhh
            i_ = jax.nn.sigmoid(g[:, :H])
            f_ = jax.nn.sigmoid(g[:, H:2 * H])
            gg = jnp.tanh(g[:, 2 * H:3 * H])
            o_ = jax.nn.sigmoid(g[:, 3 * H:])
            c = f_ * c + i_ * gg
            h = o_ * jnp.tanh(c)
            return (h, c), h
        init = (jnp.zeros((B, H), jnp.float32), jnp.zeros((B, H), jnp.float32))
        _, hs = jax.lax.scan(step, init, x_seq)
        return hs  # (T, B, H)

    fwd = run_dir(x_tm, params["wih_f"], params["whh_f"],
                  params["bih_f"], params["bhh_f"])
    bwd = run_dir(x_tm[::-1], params["wih_b"], params["whh_b"],
                  params["bih_b"], params["bhh_b"])[::-1]
    rec = jnp.concatenate([fwd, bwd], axis=-1)                   # (T, B, 2H)
    out = rec @ params["w_lin"].T + params["b_lin"]
    return jnp.transpose(out, (1, 0, 2))


if __name__ == "__main__":
    B, T, I, H, O = 2, 8, 16, 32, 16

    key = jax.random.PRNGKey(0)
    keys = jax.random.split(key, 11)
    bound = 1.0 / np.sqrt(H)

    def u(k, shape):
        return jax.random.uniform(k, shape, jnp.float32, -bound, bound)

    params = dict(
        wih_f=u(keys[0], (4 * H, I)), whh_f=u(keys[1], (4 * H, H)),
        bih_f=u(keys[2], (4 * H,)),   bhh_f=u(keys[3], (4 * H,)),
        wih_b=u(keys[4], (4 * H, I)), whh_b=u(keys[5], (4 * H, H)),
        bih_b=u(keys[6], (4 * H,)),   bhh_b=u(keys[7], (4 * H,)),
        w_lin=u(keys[8], (O, 2 * H)), b_lin=u(keys[9], (O,)),
    )
    x = jax.random.normal(keys[10], (B, T, I), jnp.float32)

    out = bidirectional_lstm(x, params, H, O)
    out = jax.block_until_ready(out)
    assert out.shape == (B, T, O)

    ref = reference(x, params, H)
    # bf16 MXU operands / resident scratch (f32 gate math + carries) -> 3e-2 tol
    np.testing.assert_allclose(np.asarray(out), np.asarray(ref),
                               atol=3e-2, rtol=3e-2)
    print("KERNEL_OK")
</pallas_src>

<mosaic_0001>
module attributes {stable_mosaic.version = 11 : i64} {
  func.func @bilstm_fused_kernel(%arg0: i32, %arg1: memref<1x64x16xbf16, #tpu.memory_space<vmem>>, %arg2: memref<16x256xbf16, #tpu.memory_space<vmem>>, %arg3: memref<1x256xf32, #tpu.memory_space<vmem>>, %arg4: memref<32x128xbf16, #tpu.memory_space<vmem>>, %arg5: memref<32x128xbf16, #tpu.memory_space<vmem>>, %arg6: memref<32x128xbf16, #tpu.memory_space<vmem>>, %arg7: memref<32x128xbf16, #tpu.memory_space<vmem>>, %arg8: memref<1x128xf32, #tpu.memory_space<vmem>>, %arg9: memref<1x64x128xf32, #tpu.memory_space<vmem>>, %arg10: memref<64x256xbf16, #tpu.memory_space<vmem>>, %arg11: memref<64x32xbf16, #tpu.memory_space<vmem>>, %arg12: memref<64x32xbf16, #tpu.memory_space<vmem>>) attributes {dimension_semantics = [#tpu.dimension_semantics<parallel>], iteration_bounds = array<i64: 1>, scalar_prefetch = 0 : i64, scratch_operands = 3 : i64, tpu.core_type = #tpu.core_type<tc>, window_params = [{transform_indices = @transform_0, window_bounds = array<i64: 1, 64, 16>}, {pipeline_mode = #tpu.pipeline_mode<synchronous>, transform_indices = @transform_1, window_bounds = array<i64: 16, 256>}, {pipeline_mode = #tpu.pipeline_mode<synchronous>, transform_indices = @transform_2, window_bounds = array<i64: 1, 256>}, {pipeline_mode = #tpu.pipeline_mode<synchronous>, transform_indices = @transform_3, window_bounds = array<i64: 32, 128>}, {pipeline_mode = #tpu.pipeline_mode<synchronous>, transform_indices = @transform_4, window_bounds = array<i64: 32, 128>}, {pipeline_mode = #tpu.pipeline_mode<synchronous>, transform_indices = @transform_5, window_bounds = array<i64: 32, 128>}, {pipeline_mode = #tpu.pipeline_mode<synchronous>, transform_indices = @transform_6, window_bounds = array<i64: 32, 128>}, {pipeline_mode = #tpu.pipeline_mode<synchronous>, transform_indices = @transform_7, window_bounds = array<i64: 1, 128>}, {transform_indices = @transform_8, window_bounds = array<i64: 1, 64, 128>}]} {
    %c0 = arith.constant 0 : index
    %c0_0 = arith.constant 0 : index
    %c0_1 = arith.constant 0 : index
    %0 = vector.load %arg1[%c0, %c0_0, %c0_1] : memref<1x64x16xbf16, #tpu.memory_space<vmem>>, vector<1x64x16xbf16>
    %1 = vector.shape_cast %0 : vector<1x64x16xbf16> to vector<64x16xbf16>
    %c0_2 = arith.constant 0 : index
    %c0_3 = arith.constant 0 : index
    %2 = vector.load %arg2[%c0_2, %c0_3] : memref<16x256xbf16, #tpu.memory_space<vmem>>, vector<16x256xbf16>
    %cst = arith.constant dense<0.000000e+00> : vector<64x256xf32>
    %3 = tpu.matmul %1, %2, %cst {dimension_numbers = #tpu.dot_dimension_numbers<[1], [0], [0], [1], [0, 0, 1, 1], [], []>} : vector<64x16xbf16>, vector<16x256xbf16>, vector<64x256xf32> -> vector<64x256xf32>
    %c0_4 = arith.constant 0 : index
    %c0_5 = arith.constant 0 : index
    %4 = vector.load %arg3[%c0_4, %c0_5] : memref<1x256xf32, #tpu.memory_space<vmem>>, vector<1x256xf32>
    %5 = vector.broadcast %4 : vector<1x256xf32> to vector<64x256xf32>
    %6 = arith.addf %3, %5 : vector<64x256xf32>
    %7 = arith.truncf %6 : vector<64x256xf32> to vector<64x256xbf16>
    %c0_6 = arith.constant 0 : index
    %c0_7 = arith.constant 0 : index
    %8 = vector.load %arg10[%c0_6, %c0_7] : memref<64x256xbf16, #tpu.memory_space<vmem>>, vector<64x256xbf16>
    tpu.vector_store %arg10[%c0_6, %c0_7], %7 {strides = array<i32>} : memref<64x256xbf16, #tpu.memory_space<vmem>>, vector<64x256xbf16>,
    %c0_8 = arith.constant 0 : index
    %c0_9 = arith.constant 0 : index
    %9 = vector.load %arg4[%c0_8, %c0_9] : memref<32x128xbf16, #tpu.memory_space<vmem>>, vector<32x128xbf16>
    %c0_10 = arith.constant 0 : index
    %c0_11 = arith.constant 0 : index
    %10 = vector.load %arg5[%c0_10, %c0_11] : memref<32x128xbf16, #tpu.memory_space<vmem>>, vector<32x128xbf16>
    %cst_12 = arith.constant 0.000000e+00 : f32
    %11 = vector.broadcast %cst_12 : f32 to vector<8x32xf32>
    %c0_i32 = arith.constant 0 : i32
    %12 = arith.truncf %11 : vector<8x32xf32> to vector<8x32xbf16>
    %cst_13 = arith.constant dense<0.000000e+00> : vector<8x128xf32>
    %13 = tpu.matmul %12, %9, %cst_13 {dimension_numbers = #tpu.dot_dimension_numbers<[1], [0], [0], [1], [0, 0, 1, 1], [], []>} : vector<8x32xbf16>, vector<32x128xbf16>, vector<8x128xf32> -> vector<8x128xf32>
    %14 = arith.truncf %11 : vector<8x32xf32> to vector<8x32xbf16>
    %cst_14 = arith.constant dense<0.000000e+00> : vector<8x128xf32>
    %15 = tpu.matmul %14, %10, %cst_14 {dimension_numbers = #tpu.dot_dimension_numbers<[1], [0], [0], [1], [0, 0, 1, 1], [], []>} : vector<8x32xbf16>, vector<32x128xbf16>, vector<8x128xf32> -> vector<8x128xf32>
    %c8_i32 = arith.constant 8 : i32
    %16 = arith.muli %c0_i32, %c8_i32 : i32
    %17 = tpu.assume_multiple %16, 8 : i32
    %c7_i32 = arith.constant 7 : i32
    %18 = arith.subi %c7_i32, %c0_i32 : i32
    %c8_i32_15 = arith.constant 8 : i32
    %19 = arith.muli %18, %c8_i32_15 : i32
    %20 = tpu.assume_multiple %19, 8 : i32
    %21 = arith.index_cast %17 : i32 to index
    %c0_16 = arith.constant 0 : index
    %22 = vector.load %arg10[%21, %c0_16] : memref<64x256xbf16, #tpu.memory_space<vmem>>, vector<8x128xbf16>
    %23 = arith.extf %22 : vector<8x128xbf16> to vector<8x128xf32>
    %24 = arith.index_cast %20 : i32 to index
    %c128 = arith.constant 128 : index
    %25 = vector.load %arg10[%24, %c128] : memref<64x256xbf16, #tpu.memory_space<vmem>>, vector<8x128xbf16>
    %26 = arith.extf %25 : vector<8x128xbf16> to vector<8x128xf32>
    %27 = arith.addf %23, %13 : vector<8x128xf32>
    %28 = vector.extract_strided_slice %27 {offsets = [0, 0], sizes = [8, 96], strides = [1, 1]} : vector<8x128xf32> to vector<8x96xf32>
    %29 = arith.negf %28 : vector<8x96xf32>
    %30 = math.exp %29 : vector<8x96xf32>
    %cst_17 = arith.constant 1.000000e+00 : f32
    %31 = vector.broadcast %cst_17 : f32 to vector<8x96xf32>
    %32 = arith.addf %31, %30 : vector<8x96xf32>
    %33 = arith.divf %31, %32 : vector<8x96xf32>
    %34 = vector.extract_strided_slice %27 {offsets = [0, 96], sizes = [8, 32], strides = [1, 1]} : vector<8x128xf32> to vector<8x32xf32>
    %35 = math.tanh %34 : vector<8x32xf32>
    %36 = vector.extract_strided_slice %33 {offsets = [0, 0], sizes = [8, 32], strides = [1, 1]} : vector<8x96xf32> to vector<8x32xf32>
    %37 = vector.extract_strided_slice %33 {offsets = [0, 32], sizes = [8, 32], strides = [1, 1]} : vector<8x96xf32> to vector<8x32xf32>
    %38 = vector.extract_strided_slice %33 {offsets = [0, 64], sizes = [8, 32], strides = [1, 1]} : vector<8x96xf32> to vector<8x32xf32>
    %39 = arith.mulf %37, %11 : vector<8x32xf32>
    %40 = arith.mulf %36, %35 : vector<8x32xf32>
    %41 = arith.addf %39, %40 : vector<8x32xf32>
    %42 = math.tanh %41 : vector<8x32xf32>
    %43 = arith.mulf %38, %42 : vector<8x32xf32>
    %44 = arith.addf %26, %15 : vector<8x128xf32>
    %45 = vector.extract_strided_slice %44 {offsets = [0, 0], sizes = [8, 96], strides = [1, 1]} : vector<8x128xf32> to vector<8x96xf32>
    %46 = arith.negf %45 : vector<8x96xf32>
    %47 = math.exp %46 : vector<8x96xf32>
    %cst_18 = arith.constant 1.000000e+00 : f32
    %48 = vector.broadcast %cst_18 : f32 to vector<8x96xf32>
    %49 = arith.addf %48, %47 : vector<8x96xf32>
    %50 = arith.divf %48, %49 : vector<8x96xf32>
    %51 = vector.extract_strided_slice %44 {offsets = [0, 96], sizes = [8, 32], strides = [1, 1]} : vector<8x128xf32> to vector<8x32xf32>
    %52 = math.tanh %51 : vector<8x32xf32>
    %53 = vector.extract_strided_slice %50 {offsets = [0, 0], sizes = [8, 32], strides = [1, 1]} : vector<8x96xf32> to vector<8x32xf32>
    %54 = vector.extract_strided_slice %50 {offsets = [0, 32], sizes = [8, 32], strides = [1, 1]} : vector<8x96xf32> to vector<8x32xf32>
    %55 = vector.extract_strided_slice %50 {offsets = [0, 64], sizes = [8, 32], strides = [1, 1]} : vector<8x96xf32> to vector<8x32xf32>
    %56 = arith.mulf %54, %11 : vector<8x32xf32>
    %57 = arith.mulf %53, %52 : vector<8x32xf32>
    %58 = arith.addf %56, %57 : vector<8x32xf32>
    %59 = math.tanh %58 : vector<8x32xf32>
    %60 = arith.mulf %55, %59 : vector<8x32xf32>
    %61 = arith.truncf %43 : vector<8x32xf32> to vector<8x32xbf16>
    %62 = arith.index_cast %17 : i32 to index
    %c0_19 = arith.constant 0 : index
    %63 = vector.load %arg11[%62, %c0_19] : memref<64x32xbf16, #tpu.memory_space<vmem>>, vector<8x32xbf16>
    tpu.vector_store %arg11[%62, %c0_19], %61 {strides = array<i32>} : memref<64x32xbf16, #tpu.memory_space<vmem>>, vector<8x32xbf16>,
    %64 = arith.truncf %60 : vector<8x32xf32> to vector<8x32xbf16>
    %65 = arith.index_cast %20 : i32 to index
    %c0_20 = arith.constant 0 : index
    %66 = vector.load %arg12[%65, %c0_20] : memref<64x32xbf16, #tpu.memory_space<vmem>>, vector<8x32xbf16>
    tpu.vector_store %arg12[%65, %c0_20], %64 {strides = array<i32>} : memref<64x32xbf16, #tpu.memory_space<vmem>>, vector<8x32xbf16>,
    %c1_i32 = arith.constant 1 : i32
    %67 = arith.truncf %43 : vector<8x32xf32> to vector<8x32xbf16>
    %cst_21 = arith.constant dense<0.000000e+00> : vector<8x128xf32>
    %68 = tpu.matmul %67, %9, %cst_21 {dimension_numbers = #tpu.dot_dimension_numbers<[1], [0], [0], [1], [0, 0, 1, 1], [], []>} : vector<8x32xbf16>, vector<32x128xbf16>, vector<8x128xf32> -> vector<8x128xf32>
    %69 = arith.truncf %60 : vector<8x32xf32> to vector<8x32xbf16>
    %cst_22 = arith.constant dense<0.000000e+00> : vector<8x128xf32>
    %70 = tpu.matmul %69, %10, %cst_22 {dimension_numbers = #tpu.dot_dimension_numbers<[1], [0], [0], [1], [0, 0, 1, 1], [], []>} : vector<8x32xbf16>, vector<32x128xbf16>, vector<8x128xf32> -> vector<8x128xf32>
    %c8_i32_23 = arith.constant 8 : i32
    %71 = arith.muli %c1_i32, %c8_i32_23 : i32
    %72 = tpu.assume_multiple %71, 8 : i32
    %c7_i32_24 = arith.constant 7 : i32
    %73 = arith.subi %c7_i32_24, %c1_i32 : i32
    %c8_i32_25 = arith.constant 8 : i32
    %74 = arith.muli %73, %c8_i32_25 : i32
    %75 = tpu.assume_multiple %74, 8 : i32
    %76 = arith.index_cast %72 : i32 to index
    %c0_26 = arith.constant 0 : index
    %77 = vector.load %arg10[%76, %c0_26] : memref<64x256xbf16, #tpu.memory_space<vmem>>, vector<8x128xbf16>
    %78 = arith.extf %77 : vector<8x128xbf16> to vector<8x128xf32>
    %79 = arith.index_cast %75 : i32 to index
    %c128_27 = arith.constant 128 : index
    %80 = vector.load %arg10[%79, %c128_27] : memref<64x256xbf16, #tpu.memory_space<vmem>>, vector<8x128xbf16>
    %81 = arith.extf %80 : vector<8x128xbf16> to vector<8x128xf32>
    %82 = arith.addf %78, %68 : vector<8x128xf32>
    %83 = vector.extract_strided_slice %82 {offsets = [0, 0], sizes = [8, 96], strides = [1, 1]} : vector<8x128xf32> to vector<8x96xf32>
    %84 = arith.negf %83 : vector<8x96xf32>
    %85 = math.exp %84 : vector<8x96xf32>
    %cst_28 = arith.constant 1.000000e+00 : f32
    %86 = vector.broadcast %cst_28 : f32 to vector<8x96xf32>
    %87 = arith.addf %86, %85 : vector<8x96xf32>
    %88 = arith.divf %86, %87 : vector<8x96xf32>
    %89 = vector.extract_strided_slice %82 {offsets = [0, 96], sizes = [8, 32], strides = [1, 1]} : vector<8x128xf32> to vector<8x32xf32>
    %90 = math.tanh %89 : vector<8x32xf32>
    %91 = vector.extract_strided_slice %88 {offsets = [0, 0], sizes = [8, 32], strides = [1, 1]} : vector<8x96xf32> to vector<8x32xf32>
    %92 = vector.extract_strided_slice %88 {offsets = [0, 32], sizes = [8, 32], strides = [1, 1]} : vector<8x96xf32> to vector<8x32xf32>
    %93 = vector.extract_strided_slice %88 {offsets = [0, 64], sizes = [8, 32], strides = [1, 1]} : vector<8x96xf32> to vector<8x32xf32>
    %94 = arith.mulf %92, %41 : vector<8x32xf32>
    %95 = arith.mulf %91, %90 : vector<8x32xf32>
    %96 = arith.addf %94, %95 : vector<8x32xf32>
    %97 = math.tanh %96 : vector<8x32xf32>
    %98 = arith.mulf %93, %97 : vector<8x32xf32>
    %99 = arith.addf %81, %70 : vector<8x128xf32>
    %100 = vector.extract_strided_slice %99 {offsets = [0, 0], sizes = [8, 96], strides = [1, 1]} : vector<8x128xf32> to vector<8x96xf32>
    %101 = arith.negf %100 : vector<8x96xf32>
    %102 = math.exp %101 : vector<8x96xf32>
    %cst_29 = arith.constant 1.000000e+00 : f32
    %103 = vector.broadcast %cst_29 : f32 to vector<8x96xf32>
    %104 = arith.addf %103, %102 : vector<8x96xf32>
    %105 = arith.divf %103, %104 : vector<8x96xf32>
    %106 = vector.extract_strided_slice %99 {offsets = [0, 96], sizes = [8, 32], strides = [1, 1]} : vector<8x128xf32> to vector<8x32xf32>
    %107 = math.tanh %106 : vector<8x32xf32>
    %108 = vector.extract_strided_slice %105 {offsets = [0, 0], sizes = [8, 32], strides = [1, 1]} : vector<8x96xf32> to vector<8x32xf32>
    %109 = vector.extract_strided_slice %105 {offsets = [0, 32], sizes = [8, 32], strides = [1, 1]} : vector<8x96xf32> to vector<8x32xf32>
    %110 = vector.extract_strided_slice %105 {offsets = [0, 64], sizes = [8, 32], strides = [1, 1]} : vector<8x96xf32> to vector<8x32xf32>
    %111 = arith.mulf %109, %58 : vector<8x32xf32>
    %112 = arith.mulf %108, %107 : vector<8x32xf32>
    %113 = arith.addf %111, %112 : vector<8x32xf32>
    %114 = math.tanh %113 : vector<8x32xf32>
    %115 = arith.mulf %110, %114 : vector<8x32xf32>
    %116 = arith.truncf %98 : vector<8x32xf32> to vector<8x32xbf16>
    %117 = arith.index_cast %72 : i32 to index
    %c0_30 = arith.constant 0 : index
    %118 = vector.load %arg11[%117, %c0_30] : memref<64x32xbf16, #tpu.memory_space<vmem>>, vector<8x32xbf16>
    tpu.vector_store %arg11[%117, %c0_30], %116 {strides = array<i32>} : memref<64x32xbf16, #tpu.memory_space<vmem>>, vector<8x32xbf16>,
    %119 = arith.truncf %115 : vector<8x32xf32> to vector<8x32xbf16>
    %120 = arith.index_cast %75 : i32 to index
    %c0_31 = arith.constant 0 : index
    %121 = vector.load %arg12[%120, %c0_31] : memref<64x32xbf16, #tpu.memory_space<vmem>>, vector<8x32xbf16>
    tpu.vector_store %arg12[%120, %c0_31], %119 {strides = array<i32>} : memref<64x32xbf16, #tpu.memory_space<vmem>>, vector<8x32xbf16>,
    %c2_i32 = arith.constant 2 : i32
    %122 = arith.truncf %98 : vector<8x32xf32> to vector<8x32xbf16>
    %cst_32 = arith.constant dense<0.000000e+00> : vector<8x128xf32>
    %123 = tpu.matmul %122, %9, %cst_32 {dimension_numbers = #tpu.dot_dimension_numbers<[1], [0], [0], [1], [0, 0, 1, 1], [], []>} : vector<8x32xbf16>, vector<32x128xbf16>, vector<8x128xf32> -> vector<8x128xf32>
    %124 = arith.truncf %115 : vector<8x32xf32> to vector<8x32xbf16>
    %cst_33 = arith.constant dense<0.000000e+00> : vector<8x128xf32>
    %125 = tpu.matmul %124, %10, %cst_33 {dimension_numbers = #tpu.dot_dimension_numbers<[1], [0], [0], [1], [0, 0, 1, 1], [], []>} : vector<8x32xbf16>, vector<32x128xbf16>, vector<8x128xf32> -> vector<8x128xf32>
    %c8_i32_34 = arith.constant 8 : i32
    %126 = arith.muli %c2_i32, %c8_i32_34 : i32
    %127 = tpu.assume_multiple %126, 8 : i32
    %c7_i32_35 = arith.constant 7 : i32
    %128 = arith.subi %c7_i32_35, %c2_i32 : i32
    %c8_i32_36 = arith.constant 8 : i32
    %129 = arith.muli %128, %c8_i32_36 : i32
    %130 = tpu.assume_multiple %129, 8 : i32
    %131 = arith.index_cast %127 : i32 to index
    %c0_37 = arith.constant 0 : index
    %132 = vector.load %arg10[%131, %c0_37] : memref<64x256xbf16, #tpu.memory_space<vmem>>, vector<8x128xbf16>
    %133 = arith.extf %132 : vector<8x128xbf16> to vector<8x128xf32>
    %134 = arith.index_cast %130 : i32 to index
    %c128_38 = arith.constant 128 : index
    %135 = vector.load %arg10[%134, %c128_38] : memref<64x256xbf16, #tpu.memory_space<vmem>>, vector<8x128xbf16>
    %136 = arith.extf %135 : vector<8x128xbf16> to vector<8x128xf32>
    %137 = arith.addf %133, %123 : vector<8x128xf32>
    %138 = vector.extract_strided_slice %137 {offsets = [0, 0], sizes = [8, 96], strides = [1, 1]} : vector<8x128xf32> to vector<8x96xf32>
    %139 = arith.negf %138 : vector<8x96xf32>
    %140 = math.exp %139 : vector<8x96xf32>
    %cst_39 = arith.constant 1.000000e+00 : f32
    %141 = vector.broadcast %cst_39 : f32 to vector<8x96xf32>
    %142 = arith.addf %141, %140 : vector<8x96xf32>
    %143 = arith.divf %141, %142 : vector<8x96xf32>
    %144 = vector.extract_strided_slice %137 {offsets = [0, 96], sizes = [8, 32], strides = [1, 1]} : vector<8x128xf32> to vector<8x32xf32>
    %145 = math.tanh %144 : vector<8x32xf32>
    %146 = vector.extract_strided_slice %143 {offsets = [0, 0], sizes = [8, 32], strides = [1, 1]} : vector<8x96xf32> to vector<8x32xf32>
    %147 = vector.extract_strided_slice %143 {offsets = [0, 32], sizes = [8, 32], strides = [1, 1]} : vector<8x96xf32> to vector<8x32xf32>
    %148 = vector.extract_strided_slice %143 {offsets = [0, 64], sizes = [8, 32], strides = [1, 1]} : vector<8x96xf32> to vector<8x32xf32>
    %149 = arith.mulf %147, %96 : vector<8x32xf32>
    %150 = arith.mulf %146, %145 : vector<8x32xf32>
    %151 = arith.addf %149, %150 : vector<8x32xf32>
    %152 = math.tanh %151 : vector<8x32xf32>
    %153 = arith.mulf %148, %152 : vector<8x32xf32>
    %154 = arith.addf %136, %125 : vector<8x128xf32>
    %155 = vector.extract_strided_slice %154 {offsets = [0, 0], sizes = [8, 96], strides = [1, 1]} : vector<8x128xf32> to vector<8x96xf32>
    %156 = arith.negf %155 : vector<8x96xf32>
    %157 = math.exp %156 : vector<8x96xf32>
    %cst_40 = arith.constant 1.000000e+00 : f32
    %158 = vector.broadcast %cst_40 : f32 to vector<8x96xf32>
    %159 = arith.addf %158, %157 : vector<8x96xf32>
    %160 = arith.divf %158, %159 : vector<8x96xf32>
    %161 = vector.extract_strided_slice %154 {offsets = [0, 96], sizes = [8, 32], strides = [1, 1]} : vector<8x128xf32> to vector<8x32xf32>
    %162 = math.tanh %161 : vector<8x32xf32>
    %163 = vector.extract_strided_slice %160 {offsets = [0, 0], sizes = [8, 32], strides = [1, 1]} : vector<8x96xf32> to vector<8x32xf32>
    %164 = vector.extract_strided_slice %160 {offsets = [0, 32], sizes = [8, 32], strides = [1, 1]} : vector<8x96xf32> to vector<8x32xf32>
    %165 = vector.extract_strided_slice %160 {offsets = [0, 64], sizes = [8, 32], strides = [1, 1]} : vector<8x96xf32> to vector<8x32xf32>
    %166 = arith.mulf %164, %113 : vector<8x32xf32>
    %167 = arith.mulf %163, %162 : vector<8x32xf32>
    %168 = arith.addf %166, %167 : vector<8x32xf32>
    %169 = math.tanh %168 : vector<8x32xf32>
    %170 = arith.mulf %165, %169 : vector<8x32xf32>
    %171 = arith.truncf %153 : vector<8x32xf32> to vector<8x32xbf16>
    %172 = arith.index_cast %127 : i32 to index
    %c0_41 = arith.constant 0 : index
    %173 = vector.load %arg11[%172, %c0_41] : memref<64x32xbf16, #tpu.memory_space<vmem>>, vector<8x32xbf16>
    tpu.vector_store %arg11[%172, %c0_41], %171 {strides = array<i32>} : memref<64x32xbf16, #tpu.memory_space<vmem>>, vector<8x32xbf16>,
    %174 = arith.truncf %170 : vector<8x32xf32> to vector<8x32xbf16>
    %175 = arith.index_cast %130 : i32 to index
    %c0_42 = arith.constant 0 : index
    %176 = vector.load %arg12[%175, %c0_42] : memref<64x32xbf16, #tpu.memory_space<vmem>>, vector<8x32xbf16>
    tpu.vector_store %arg12[%175, %c0_42], %174 {strides = array<i32>} : memref<64x32xbf16, #tpu.memory_space<vmem>>, vector<8x32xbf16>,
    %c3_i32 = arith.constant 3 : i32
    %177 = arith.truncf %153 : vector<8x32xf32> to vector<8x32xbf16>
    %cst_43 = arith.constant dense<0.000000e+00> : vector<8x128xf32>
    %178 = tpu.matmul %177, %9, %cst_43 {dimension_numbers = #tpu.dot_dimension_numbers<[1], [0], [0], [1], [0, 0, 1, 1], [], []>} : vector<8x32xbf16>, vector<32x128xbf16>, vector<8x128xf32> -> vector<8x128xf32>
    %179 = arith.truncf %170 : vector<8x32xf32> to vector<8x32xbf16>
    %cst_44 = arith.constant dense<0.000000e+00> : vector<8x128xf32>
    %180 = tpu.matmul %179, %10, %cst_44 {dimension_numbers = #tpu.dot_dimension_numbers<[1], [0], [0], [1], [0, 0, 1, 1], [], []>} : vector<8x32xbf16>, vector<32x128xbf16>, vector<8x128xf32> -> vector<8x128xf32>
    %c8_i32_45 = arith.constant 8 : i32
    %181 = arith.muli %c3_i32, %c8_i32_45 : i32
    %182 = tpu.assume_multiple %181, 8 : i32
    %c7_i32_46 = arith.constant 7 : i32
    %183 = arith.subi %c7_i32_46, %c3_i32 : i32
    %c8_i32_47 = arith.constant 8 : i32
    %184 = arith.muli %183, %c8_i32_47 : i32
    %185 = tpu.assume_multiple %184, 8 : i32
    %186 = arith.index_cast %182 : i32 to index
    %c0_48 = arith.constant 0 : index
    %187 = vector.load %arg10[%186, %c0_48] : memref<64x256xbf16, #tpu.memory_space<vmem>>, vector<8x128xbf16>
    %188 = arith.extf %187 : vector<8x128xbf16> to vector<8x128xf32>
    %189 = arith.index_cast %185 : i32 to index
    %c128_49 = arith.constant 128 : index
    %190 = vector.load %arg10[%189, %c128_49] : memref<64x256xbf16, #tpu.memory_space<vmem>>, vector<8x128xbf16>
    %191 = arith.extf %190 : vector<8x128xbf16> to vector<8x128xf32>
    %192 = arith.addf %188, %178 : vector<8x128xf32>
    %193 = vector.extract_strided_slice %192 {offsets = [0, 0], sizes = [8, 96], strides = [1, 1]} : vector<8x128xf32> to vector<8x96xf32>
    %194 = arith.negf %193 : vector<8x96xf32>
    %195 = math.exp %194 : vector<8x96xf32>
    %cst_50 = arith.constant 1.000000e+00 : f32
    %196 = vector.broadcast %cst_50 : f32 to vector<8x96xf32>
    %197 = arith.addf %196, %195 : vector<8x96xf32>
    %198 = arith.divf %196, %197 : vector<8x96xf32>
    %199 = vector.extract_strided_slice %192 {offsets = [0, 96], sizes = [8, 32], strides = [1, 1]} : vector<8x128xf32> to vector<8x32xf32>
    %200 = math.tanh %199 : vector<8x32xf32>
    %201 = vector.extract_strided_slice %198 {offsets = [0, 0], sizes = [8, 32], strides = [1, 1]} : vector<8x96xf32> to vector<8x32xf32>
    %202 = vector.extract_strided_slice %198 {offsets = [0, 32], sizes = [8, 32], strides = [1, 1]} : vector<8x96xf32> to vector<8x32xf32>
    %203 = vector.extract_strided_slice %198 {offsets = [0, 64], sizes = [8, 32], strides = [1, 1]} : vector<8x96xf32> to vector<8x32xf32>
    %204 = arith.mulf %202, %151 : vector<8x32xf32>
    %205 = arith.mulf %201, %200 : vector<8x32xf32>
    %206 = arith.addf %204, %205 : vector<8x32xf32>
    %207 = math.tanh %206 : vector<8x32xf32>
    %208 = arith.mulf %203, %207 : vector<8x32xf32>
    %209 = arith.addf %191, %180 : vector<8x128xf32>
    %210 = vector.extract_strided_slice %209 {offsets = [0, 0], sizes = [8, 96], strides = [1, 1]} : vector<8x128xf32> to vector<8x96xf32>
    %211 = arith.negf %210 : vector<8x96xf32>
    %212 = math.exp %211 : vector<8x96xf32>
    %cst_51 = arith.constant 1.000000e+00 : f32
    %213 = vector.broadcast %cst_51 : f32 to vector<8x96xf32>
    %214 = arith.addf %213, %212 : vector<8x96xf32>
    %215 = arith.divf %213, %214 : vector<8x96xf32>
    %216 = vector.extract_strided_slice %209 {offsets = [0, 96], sizes = [8, 32], strides = [1, 1]} : vector<8x128xf32> to vector<8x32xf32>
    %217 = math.tanh %216 : vector<8x32xf32>
    %218 = vector.extract_strided_slice %215 {offsets = [0, 0], sizes = [8, 32], strides = [1, 1]} : vector<8x96xf32> to vector<8x32xf32>
    %219 = vector.extract_strided_slice %215 {offsets = [0, 32], sizes = [8, 32], strides = [1, 1]} : vector<8x96xf32> to vector<8x32xf32>
    %220 = vector.extract_strided_slice %215 {offsets = [0, 64], sizes = [8, 32], strides = [1, 1]} : vector<8x96xf32> to vector<8x32xf32>
    %221 = arith.mulf %219, %168 : vector<8x32xf32>
    %222 = arith.mulf %218, %217 : vector<8x32xf32>
    %223 = arith.addf %221, %222 : vector<8x32xf32>
    %224 = math.tanh %223 : vector<8x32xf32>
    %225 = arith.mulf %220, %224 : vector<8x32xf32>
    %226 = arith.truncf %208 : vector<8x32xf32> to vector<8x32xbf16>
    %227 = arith.index_cast %182 : i32 to index
    %c0_52 = arith.constant 0 : index
    %228 = vector.load %arg11[%227, %c0_52] : memref<64x32xbf16, #tpu.memory_space<vmem>>, vector<8x32xbf16>
    tpu.vector_store %arg11[%227, %c0_52], %226 {strides = array<i32>} : memref<64x32xbf16, #tpu.memory_space<vmem>>, vector<8x32xbf16>,
    %229 = arith.truncf %225 : vector<8x32xf32> to vector<8x32xbf16>
    %230 = arith.index_cast %185 : i32 to index
    %c0_53 = arith.constant 0 : index
    %231 = vector.load %arg12[%230, %c0_53] : memref<64x32xbf16, #tpu.memory_space<vmem>>, vector<8x32xbf16>
    tpu.vector_store %arg12[%230, %c0_53], %229 {strides = array<i32>} : memref<64x32xbf16, #tpu.memory_space<vmem>>, vector<8x32xbf16>,
    %c4_i32 = arith.constant 4 : i32
    %232 = arith.truncf %208 : vector<8x32xf32> to vector<8x32xbf16>
    %cst_54 = arith.constant dense<0.000000e+00> : vector<8x128xf32>
    %233 = tpu.matmul %232, %9, %cst_54 {dimension_numbers = #tpu.dot_dimension_numbers<[1], [0], [0], [1], [0, 0, 1, 1], [], []>} : vector<8x32xbf16>, vector<32x128xbf16>, vector<8x128xf32> -> vector<8x128xf32>
    %234 = arith.truncf %225 : vector<8x32xf32> to vector<8x32xbf16>
    %cst_55 = arith.constant dense<0.000000e+00> : vector<8x128xf32>
    %235 = tpu.matmul %234, %10, %cst_55 {dimension_numbers = #tpu.dot_dimension_numbers<[1], [0], [0], [1], [0, 0, 1, 1], [], []>} : vector<8x32xbf16>, vector<32x128xbf16>, vector<8x128xf32> -> vector<8x128xf32>
    %c8_i32_56 = arith.constant 8 : i32
    %236 = arith.muli %c4_i32, %c8_i32_56 : i32
    %237 = tpu.assume_multiple %236, 8 : i32
    %c7_i32_57 = arith.constant 7 : i32
    %238 = arith.subi %c7_i32_57, %c4_i32 : i32
    %c8_i32_58 = arith.constant 8 : i32
    %239 = arith.muli %238, %c8_i32_58 : i32
    %240 = tpu.assume_multiple %239, 8 : i32
    %241 = arith.index_cast %237 : i32 to index
    %c0_59 = arith.constant 0 : index
    %242 = vector.load %arg10[%241, %c0_59] : memref<64x256xbf16, #tpu.memory_space<vmem>>, vector<8x128xbf16>
    %243 = arith.extf %242 : vector<8x128xbf16> to vector<8x128xf32>
    %244 = arith.index_cast %240 : i32 to index
    %c128_60 = arith.constant 128 : index
    %245 = vector.load %arg10[%244, %c128_60] : memref<64x256xbf16, #tpu.memory_space<vmem>>, vector<8x128xbf16>
    %246 = arith.extf %245 : vector<8x128xbf16> to vector<8x128xf32>
    %247 = arith.addf %243, %233 : vector<8x128xf32>
    %248 = vector.extract_strided_slice %247 {offsets = [0, 0], sizes = [8, 96], strides = [1, 1]} : vector<8x128xf32> to vector<8x96xf32>
    %249 = arith.negf %248 : vector<8x96xf32>
    %250 = math.exp %249 : vector<8x96xf32>
    %cst_61 = arith.constant 1.000000e+00 : f32
    %251 = vector.broadcast %cst_61 : f32 to vector<8x96xf32>
    %252 = arith.addf %251, %250 : vector<8x96xf32>
    %253 = arith.divf %251, %252 : vector<8x96xf32>
    %254 = vector.extract_strided_slice %247 {offsets = [0, 96], sizes = [8, 32], strides = [1, 1]} : vector<8x128xf32> to vector<8x32xf32>
    %255 = math.tanh %254 : vector<8x32xf32>
    %256 = vector.extract_strided_slice %253 {offsets = [0, 0], sizes = [8, 32], strides = [1, 1]} : vector<8x96xf32> to vector<8x32xf32>
    %257 = vector.extract_strided_slice %253 {offsets = [0, 32], sizes = [8, 32], strides = [1, 1]} : vector<8x96xf32> to vector<8x32xf32>
    %258 = vector.extract_strided_slice %253 {offsets = [0, 64], sizes = [8, 32], strides = [1, 1]} : vector<8x96xf32> to vector<8x32xf32>
    %259 = arith.mulf %257, %206 : vector<8x32xf32>
    %260 = arith.mulf %256, %255 : vector<8x32xf32>
    %261 = arith.addf %259, %260 : vector<8x32xf32>
    %262 = math.tanh %261 : vector<8x32xf32>
    %263 = arith.mulf %258, %262 : vector<8x32xf32>
    %264 = arith.addf %246, %235 : vector<8x128xf32>
    %265 = vector.extract_strided_slice %264 {offsets = [0, 0], sizes = [8, 96], strides = [1, 1]} : vector<8x128xf32> to vector<8x96xf32>
    %266 = arith.negf %265 : vector<8x96xf32>
    %267 = math.exp %266 : vector<8x96xf32>
    %cst_62 = arith.constant 1.000000e+00 : f32
    %268 = vector.broadcast %cst_62 : f32 to vector<8x96xf32>
    %269 = arith.addf %268, %267 : vector<8x96xf32>
    %270 = arith.divf %268, %269 : vector<8x96xf32>
    %271 = vector.extract_strided_slice %264 {offsets = [0, 96], sizes = [8, 32], strides = [1, 1]} : vector<8x128xf32> to vector<8x32xf32>
    %272 = math.tanh %271 : vector<8x32xf32>
    %273 = vector.extract_strided_slice %270 {offsets = [0, 0], sizes = [8, 32], strides = [1, 1]} : vector<8x96xf32> to vector<8x32xf32>
    %274 = vector.extract_strided_slice %270 {offsets = [0, 32], sizes = [8, 32], strides = [1, 1]} : vector<8x96xf32> to vector<8x32xf32>
    %275 = vector.extract_strided_slice %270 {offsets = [0, 64], sizes = [8, 32], strides = [1, 1]} : vector<8x96xf32> to vector<8x32xf32>
    %276 = arith.mulf %274, %223 : vector<8x32xf32>
    %277 = arith.mulf %273, %272 : vector<8x32xf32>
    %278 = arith.addf %276, %277 : vector<8x32xf32>
    %279 = math.tanh %278 : vector<8x32xf32>
    %280 = arith.mulf %275, %279 : vector<8x32xf32>
    %281 = arith.truncf %263 : vector<8x32xf32> to vector<8x32xbf16>
    %282 = arith.index_cast %237 : i32 to index
    %c0_63 = arith.constant 0 : index
    %283 = vector.load %arg11[%282, %c0_63] : memref<64x32xbf16, #tpu.memory_space<vmem>>, vector<8x32xbf16>
    tpu.vector_store %arg11[%282, %c0_63], %281 {strides = array<i32>} : memref<64x32xbf16, #tpu.memory_space<vmem>>, vector<8x32xbf16>,
    %284 = arith.truncf %280 : vector<8x32xf32> to vector<8x32xbf16>
    %285 = arith.index_cast %240 : i32 to index
    %c0_64 = arith.constant 0 : index
    %286 = vector.load %arg12[%285, %c0_64] : memref<64x32xbf16, #tpu.memory_space<vmem>>, vector<8x32xbf16>
    tpu.vector_store %arg12[%285, %c0_64], %284 {strides = array<i32>} : memref<64x32xbf16, #tpu.memory_space<vmem>>, vector<8x32xbf16>,
    %c5_i32 = arith.constant 5 : i32
    %287 = arith.truncf %263 : vector<8x32xf32> to vector<8x32xbf16>
    %cst_65 = arith.constant dense<0.000000e+00> : vector<8x128xf32>
    %288 = tpu.matmul %287, %9, %cst_65 {dimension_numbers = #tpu.dot_dimension_numbers<[1], [0], [0], [1], [0, 0, 1, 1], [], []>} : vector<8x32xbf16>, vector<32x128xbf16>, vector<8x128xf32> -> vector<8x128xf32>
    %289 = arith.truncf %280 : vector<8x32xf32> to vector<8x32xbf16>
    %cst_66 = arith.constant dense<0.000000e+00> : vector<8x128xf32>
    %290 = tpu.matmul %289, %10, %cst_66 {dimension_numbers = #tpu.dot_dimension_numbers<[1], [0], [0], [1], [0, 0, 1, 1], [], []>} : vector<8x32xbf16>, vector<32x128xbf16>, vector<8x128xf32> -> vector<8x128xf32>
    %c8_i32_67 = arith.constant 8 : i32
    %291 = arith.muli %c5_i32, %c8_i32_67 : i32
    %292 = tpu.assume_multiple %291, 8 : i32
    %c7_i32_68 = arith.constant 7 : i32
    %293 = arith.subi %c7_i32_68, %c5_i32 : i32
    %c8_i32_69 = arith.constant 8 : i32
    %294 = arith.muli %293, %c8_i32_69 : i32
    %295 = tpu.assume_multiple %294, 8 : i32
    %296 = arith.index_cast %292 : i32 to index
    %c0_70 = arith.constant 0 : index
    %297 = vector.load %arg10[%296, %c0_70] : memref<64x256xbf16, #tpu.memory_space<vmem>>, vector<8x128xbf16>
    %298 = arith.extf %297 : vector<8x128xbf16> to vector<8x128xf32>
    %299 = arith.index_cast %295 : i32 to index
    %c128_71 = arith.constant 128 : index
    %300 = vector.load %arg10[%299, %c128_71] : memref<64x256xbf16, #tpu.memory_space<vmem>>, vector<8x128xbf16>
    %301 = arith.extf %300 : vector<8x128xbf16> to vector<8x128xf32>
    %302 = arith.addf %298, %288 : vector<8x128xf32>
    %303 = vector.extract_strided_slice %302 {offsets = [0, 0], sizes = [8, 96], strides = [1, 1]} : vector<8x128xf32> to vector<8x96xf32>
    %304 = arith.negf %303 : vector<8x96xf32>
    %305 = math.exp %304 : vector<8x96xf32>
    %cst_72 = arith.constant 1.000000e+00 : f32
    %306 = vector.broadcast %cst_72 : f32 to vector<8x96xf32>
    %307 = arith.addf %306, %305 : vector<8x96xf32>
    %308 = arith.divf %306, %307 : vector<8x96xf32>
    %309 = vector.extract_strided_slice %302 {offsets = [0, 96], sizes = [8, 32], strides = [1, 1]} : vector<8x128xf32> to vector<8x32xf32>
    %310 = math.tanh %309 : vector<8x32xf32>
    %311 = vector.extract_strided_slice %308 {offsets = [0, 0], sizes = [8, 32], strides = [1, 1]} : vector<8x96xf32> to vector<8x32xf32>
    %312 = vector.extract_strided_slice %308 {offsets = [0, 32], sizes = [8, 32], strides = [1, 1]} : vector<8x96xf32> to vector<8x32xf32>
    %313 = vector.extract_strided_slice %308 {offsets = [0, 64], sizes = [8, 32], strides = [1, 1]} : vector<8x96xf32> to vector<8x32xf32>
    %314 = arith.mulf %312, %261 : vector<8x32xf32>
    %315 = arith.mulf %311, %310 : vector<8x32xf32>
    %316 = arith.addf %314, %315 : vector<8x32xf32>
    %317 = math.tanh %316 : vector<8x32xf32>
    %318 = arith.mulf %313, %317 : vector<8x32xf32>
    %319 = arith.addf %301, %290 : vector<8x128xf32>
    %320 = vector.extract_strided_slice %319 {offsets = [0, 0], sizes = [8, 96], strides = [1, 1]} : vector<8x128xf32> to vector<8x96xf32>
    %321 = arith.negf %320 : vector<8x96xf32>
    %322 = math.exp %321 : vector<8x96xf32>
    %cst_73 = arith.constant 1.000000e+00 : f32
    %323 = vector.broadcast %cst_73 : f32 to vector<8x96xf32>
    %324 = arith.addf %323, %322 : vector<8x96xf32>
    %325 = arith.divf %323, %324 : vector<8x96xf32>
    %326 = vector.extract_strided_slice %319 {offsets = [0, 96], sizes = [8, 32], strides = [1, 1]} : vector<8x128xf32> to vector<8x32xf32>
    %327 = math.tanh %326 : vector<8x32xf32>
    %328 = vector.extract_strided_slice %325 {offsets = [0, 0], sizes = [8, 32], strides = [1, 1]} : vector<8x96xf32> to vector<8x32xf32>
    %329 = vector.extract_strided_slice %325 {offsets = [0, 32], sizes = [8, 32], strides = [1, 1]} : vector<8x96xf32> to vector<8x32xf32>
    %330 = vector.extract_strided_slice %325 {offsets = [0, 64], sizes = [8, 32], strides = [1, 1]} : vector<8x96xf32> to vector<8x32xf32>
    %331 = arith.mulf %329, %278 : vector<8x32xf32>
    %332 = arith.mulf %328, %327 : vector<8x32xf32>
    %333 = arith.addf %331, %332 : vector<8x32xf32>
    %334 = math.tanh %333 : vector<8x32xf32>
    %335 = arith.mulf %330, %334 : vector<8x32xf32>
    %336 = arith.truncf %318 : vector<8x32xf32> to vector<8x32xbf16>
    %337 = arith.index_cast %292 : i32 to index
    %c0_74 = arith.constant 0 : index
    %338 = vector.load %arg11[%337, %c0_74] : memref<64x32xbf16, #tpu.memory_space<vmem>>, vector<8x32xbf16>
    tpu.vector_store %arg11[%337, %c0_74], %336 {strides = array<i32>} : memref<64x32xbf16, #tpu.memory_space<vmem>>, vector<8x32xbf16>,
    %339 = arith.truncf %335 : vector<8x32xf32> to vector<8x32xbf16>
    %340 = arith.index_cast %295 : i32 to index
    %c0_75 = arith.constant 0 : index
    %341 = vector.load %arg12[%340, %c0_75] : memref<64x32xbf16, #tpu.memory_space<vmem>>, vector<8x32xbf16>
    tpu.vector_store %arg12[%340, %c0_75], %339 {strides = array<i32>} : memref<64x32xbf16, #tpu.memory_space<vmem>>, vector<8x32xbf16>,
    %c6_i32 = arith.constant 6 : i32
    %342 = arith.truncf %318 : vector<8x32xf32> to vector<8x32xbf16>
    %cst_76 = arith.constant dense<0.000000e+00> : vector<8x128xf32>
    %343 = tpu.matmul %342, %9, %cst_76 {dimension_numbers = #tpu.dot_dimension_numbers<[1], [0], [0], [1], [0, 0, 1, 1], [], []>} : vector<8x32xbf16>, vector<32x128xbf16>, vector<8x128xf32> -> vector<8x128xf32>
    %344 = arith.truncf %335 : vector<8x32xf32> to vector<8x32xbf16>
    %cst_77 = arith.constant dense<0.000000e+00> : vector<8x128xf32>
    %345 = tpu.matmul %344, %10, %cst_77 {dimension_numbers = #tpu.dot_dimension_numbers<[1], [0], [0], [1], [0, 0, 1, 1], [], []>} : vector<8x32xbf16>, vector<32x128xbf16>, vector<8x128xf32> -> vector<8x128xf32>
    %c8_i32_78 = arith.constant 8 : i32
    %346 = arith.muli %c6_i32, %c8_i32_78 : i32
    %347 = tpu.assume_multiple %346, 8 : i32
    %c7_i32_79 = arith.constant 7 : i32
    %348 = arith.subi %c7_i32_79, %c6_i32 : i32
    %c8_i32_80 = arith.constant 8 : i32
    %349 = arith.muli %348, %c8_i32_80 : i32
    %350 = tpu.assume_multiple %349, 8 : i32
    %351 = arith.index_cast %347 : i32 to index
    %c0_81 = arith.constant 0 : index
    %352 = vector.load %arg10[%351, %c0_81] : memref<64x256xbf16, #tpu.memory_space<vmem>>, vector<8x128xbf16>
    %353 = arith.extf %352 : vector<8x128xbf16> to vector<8x128xf32>
    %354 = arith.index_cast %350 : i32 to index
    %c128_82 = arith.constant 128 : index
    %355 = vector.load %arg10[%354, %c128_82] : memref<64x256xbf16, #tpu.memory_space<vmem>>, vector<8x128xbf16>
    %356 = arith.extf %355 : vector<8x128xbf16> to vector<8x128xf32>
    %357 = arith.addf %353, %343 : vector<8x128xf32>
    %358 = vector.extract_strided_slice %357 {offsets = [0, 0], sizes = [8, 96], strides = [1, 1]} : vector<8x128xf32> to vector<8x96xf32>
    %359 = arith.negf %358 : vector<8x96xf32>
    %360 = math.exp %359 : vector<8x96xf32>
    %cst_83 = arith.constant 1.000000e+00 : f32
    %361 = vector.broadcast %cst_83 : f32 to vector<8x96xf32>
    %362 = arith.addf %361, %360 : vector<8x96xf32>
    %363 = arith.divf %361, %362 : vector<8x96xf32>
    %364 = vector.extract_strided_slice %357 {offsets = [0, 96], sizes = [8, 32], strides = [1, 1]} : vector<8x128xf32> to vector<8x32xf32>
    %365 = math.tanh %364 : vector<8x32xf32>
    %366 = vector.extract_strided_slice %363 {offsets = [0, 0], sizes = [8, 32], strides = [1, 1]} : vector<8x96xf32> to vector<8x32xf32>
    %367 = vector.extract_strided_slice %363 {offsets = [0, 32], sizes = [8, 32], strides = [1, 1]} : vector<8x96xf32> to vector<8x32xf32>
    %368 = vector.extract_strided_slice %363 {offsets = [0, 64], sizes = [8, 32], strides = [1, 1]} : vector<8x96xf32> to vector<8x32xf32>
    %369 = arith.mulf %367, %316 : vector<8x32xf32>
    %370 = arith.mulf %366, %365 : vector<8x32xf32>
    %371 = arith.addf %369, %370 : vector<8x32xf32>
    %372 = math.tanh %371 : vector<8x32xf32>
    %373 = arith.mulf %368, %372 : vector<8x32xf32>
    %374 = arith.addf %356, %345 : vector<8x128xf32>
    %375 = vector.extract_strided_slice %374 {offsets = [0, 0], sizes = [8, 96], strides = [1, 1]} : vector<8x128xf32> to vector<8x96xf32>
    %376 = arith.negf %375 : vector<8x96xf32>
    %377 = math.exp %376 : vector<8x96xf32>
    %cst_84 = arith.constant 1.000000e+00 : f32
    %378 = vector.broadcast %cst_84 : f32 to vector<8x96xf32>
    %379 = arith.addf %378, %377 : vector<8x96xf32>
    %380 = arith.divf %378, %379 : vector<8x96xf32>
    %381 = vector.extract_strided_slice %374 {offsets = [0, 96], sizes = [8, 32], strides = [1, 1]} : vector<8x128xf32> to vector<8x32xf32>
    %382 = math.tanh %381 : vector<8x32xf32>
    %383 = vector.extract_strided_slice %380 {offsets = [0, 0], sizes = [8, 32], strides = [1, 1]} : vector<8x96xf32> to vector<8x32xf32>
    %384 = vector.extract_strided_slice %380 {offsets = [0, 32], sizes = [8, 32], strides = [1, 1]} : vector<8x96xf32> to vector<8x32xf32>
    %385 = vector.extract_strided_slice %380 {offsets = [0, 64], sizes = [8, 32], strides = [1, 1]} : vector<8x96xf32> to vector<8x32xf32>
    %386 = arith.mulf %384, %333 : vector<8x32xf32>
    %387 = arith.mulf %383, %382 : vector<8x32xf32>
    %388 = arith.addf %386, %387 : vector<8x32xf32>
    %389 = math.tanh %388 : vector<8x32xf32>
    %390 = arith.mulf %385, %389 : vector<8x32xf32>
    %391 = arith.truncf %373 : vector<8x32xf32> to vector<8x32xbf16>
    %392 = arith.index_cast %347 : i32 to index
    %c0_85 = arith.constant 0 : index
    %393 = vector.load %arg11[%392, %c0_85] : memref<64x32xbf16, #tpu.memory_space<vmem>>, vector<8x32xbf16>
    tpu.vector_store %arg11[%392, %c0_85], %391 {strides = array<i32>} : memref<64x32xbf16, #tpu.memory_space<vmem>>, vector<8x32xbf16>,
    %394 = arith.truncf %390 : vector<8x32xf32> to vector<8x32xbf16>
    %395 = arith.index_cast %350 : i32 to index
    %c0_86 = arith.constant 0 : index
    %396 = vector.load %arg12[%395, %c0_86] : memref<64x32xbf16, #tpu.memory_space<vmem>>, vector<8x32xbf16>
    tpu.vector_store %arg12[%395, %c0_86], %394 {strides = array<i32>} : memref<64x32xbf16, #tpu.memory_space<vmem>>, vector<8x32xbf16>,
    %c7_i32_87 = arith.constant 7 : i32
    %397 = arith.truncf %373 : vector<8x32xf32> to vector<8x32xbf16>
    %cst_88 = arith.constant dense<0.000000e+00> : vector<8x128xf32>
    %398 = tpu.matmul %397, %9, %cst_88 {dimension_numbers = #tpu.dot_dimension_numbers<[1], [0], [0], [1], [0, 0, 1, 1], [], []>} : vector<8x32xbf16>, vector<32x128xbf16>, vector<8x128xf32> -> vector<8x128xf32>
    %399 = arith.truncf %390 : vector<8x32xf32> to vector<8x32xbf16>
    %cst_89 = arith.constant dense<0.000000e+00> : vector<8x128xf32>
    %400 = tpu.matmul %399, %10, %cst_89 {dimension_numbers = #tpu.dot_dimension_numbers<[1], [0], [0], [1], [0, 0, 1, 1], [], []>} : vector<8x32xbf16>, vector<32x128xbf16>, vector<8x128xf32> -> vector<8x128xf32>
    %c8_i32_90 = arith.constant 8 : i32
    %401 = arith.muli %c7_i32_87, %c8_i32_90 : i32
    %402 = tpu.assume_multiple %401, 8 : i32
    %c7_i32_91 = arith.constant 7 : i32
    %403 = arith.subi %c7_i32_91, %c7_i32_87 : i32
    %c8_i32_92 = arith.constant 8 : i32
    %404 = arith.muli %403, %c8_i32_92 : i32
    %405 = tpu.assume_multiple %404, 8 : i32
    %406 = arith.index_cast %402 : i32 to index
    %c0_93 = arith.constant 0 : index
    %407 = vector.load %arg10[%406, %c0_93] : memref<64x256xbf16, #tpu.memory_space<vmem>>, vector<8x128xbf16>
    %408 = arith.extf %407 : vector<8x128xbf16> to vector<8x128xf32>
    %409 = arith.index_cast %405 : i32 to index
    %c128_94 = arith.constant 128 : index
    %410 = vector.load %arg10[%409, %c128_94] : memref<64x256xbf16, #tpu.memory_space<vmem>>, vector<8x128xbf16>
    %411 = arith.extf %410 : vector<8x128xbf16> to vector<8x128xf32>
    %412 = arith.addf %408, %398 : vector<8x128xf32>
    %413 = vector.extract_strided_slice %412 {offsets = [0, 0], sizes = [8, 96], strides = [1, 1]} : vector<8x128xf32> to vector<8x96xf32>
    %414 = arith.negf %413 : vector<8x96xf32>
    %415 = math.exp %414 : vector<8x96xf32>
    %cst_95 = arith.constant 1.000000e+00 : f32
    %416 = vector.broadcast %cst_95 : f32 to vector<8x96xf32>
    %417 = arith.addf %416, %415 : vector<8x96xf32>
    %418 = arith.divf %416, %417 : vector<8x96xf32>
    %419 = vector.extract_strided_slice %412 {offsets = [0, 96], sizes = [8, 32], strides = [1, 1]} : vector<8x128xf32> to vector<8x32xf32>
    %420 = math.tanh %419 : vector<8x32xf32>
    %421 = vector.extract_strided_slice %418 {offsets = [0, 0], sizes = [8, 32], strides = [1, 1]} : vector<8x96xf32> to vector<8x32xf32>
    %422 = vector.extract_strided_slice %418 {offsets = [0, 32], sizes = [8, 32], strides = [1, 1]} : vector<8x96xf32> to vector<8x32xf32>
    %423 = vector.extract_strided_slice %418 {offsets = [0, 64], sizes = [8, 32], strides = [1, 1]} : vector<8x96xf32> to vector<8x32xf32>
    %424 = arith.mulf %422, %371 : vector<8x32xf32>
    %425 = arith.mulf %421, %420 : vector<8x32xf32>
    %426 = arith.addf %424, %425 : vector<8x32xf32>
    %427 = math.tanh %426 : vector<8x32xf32>
    %428 = arith.mulf %423, %427 : vector<8x32xf32>
    %429 = arith.addf %411, %400 : vector<8x128xf32>
    %430 = vector.extract_strided_slice %429 {offsets = [0, 0], sizes = [8, 96], strides = [1, 1]} : vector<8x128xf32> to vector<8x96xf32>
    %431 = arith.negf %430 : vector<8x96xf32>
    %432 = math.exp %431 : vector<8x96xf32>
    %cst_96 = arith.constant 1.000000e+00 : f32
    %433 = vector.broadcast %cst_96 : f32 to vector<8x96xf32>
    %434 = arith.addf %433, %432 : vector<8x96xf32>
    %435 = arith.divf %433, %434 : vector<8x96xf32>
    %436 = vector.extract_strided_slice %429 {offsets = [0, 96], sizes = [8, 32], strides = [1, 1]} : vector<8x128xf32> to vector<8x32xf32>
    %437 = math.tanh %436 : vector<8x32xf32>
    %438 = vector.extract_strided_slice %435 {offsets = [0, 0], sizes = [8, 32], strides = [1, 1]} : vector<8x96xf32> to vector<8x32xf32>
    %439 = vector.extract_strided_slice %435 {offsets = [0, 32], sizes = [8, 32], strides = [1, 1]} : vector<8x96xf32> to vector<8x32xf32>
    %440 = vector.extract_strided_slice %435 {offsets = [0, 64], sizes = [8, 32], strides = [1, 1]} : vector<8x96xf32> to vector<8x32xf32>
    %441 = arith.mulf %439, %388 : vector<8x32xf32>
    %442 = arith.mulf %438, %437 : vector<8x32xf32>
    %443 = arith.addf %441, %442 : vector<8x32xf32>
    %444 = math.tanh %443 : vector<8x32xf32>
    %445 = arith.mulf %440, %444 : vector<8x32xf32>
    %446 = arith.truncf %428 : vector<8x32xf32> to vector<8x32xbf16>
    %447 = arith.index_cast %402 : i32 to index
    %c0_97 = arith.constant 0 : index
    %448 = vector.load %arg11[%447, %c0_97] : memref<64x32xbf16, #tpu.memory_space<vmem>>, vector<8x32xbf16>
    tpu.vector_store %arg11[%447, %c0_97], %446 {strides = array<i32>} : memref<64x32xbf16, #tpu.memory_space<vmem>>, vector<8x32xbf16>,
    %449 = arith.truncf %445 : vector<8x32xf32> to vector<8x32xbf16>
    %450 = arith.index_cast %405 : i32 to index
    %c0_98 = arith.constant 0 : index
    %451 = vector.load %arg12[%450, %c0_98] : memref<64x32xbf16, #tpu.memory_space<vmem>>, vector<8x32xbf16>
    tpu.vector_store %arg12[%450, %c0_98], %449 {strides = array<i32>} : memref<64x32xbf16, #tpu.memory_space<vmem>>, vector<8x32xbf16>,
    %c8_i32_99 = arith.constant 8 : i32
    %c0_100 = arith.constant 0 : index
    %c0_101 = arith.constant 0 : index
    %452 = vector.load %arg11[%c0_100, %c0_101] : memref<64x32xbf16, #tpu.memory_space<vmem>>, vector<64x32xbf16>
    %c0_102 = arith.constant 0 : index
    %c0_103 = arith.constant 0 : index
    %453 = vector.load %arg6[%c0_102, %c0_103] : memref<32x128xbf16, #tpu.memory_space<vmem>>, vector<32x128xbf16>
    %cst_104 = arith.constant dense<0.000000e+00> : vector<64x128xf32>
    %454 = tpu.matmul %452, %453, %cst_104 {dimension_numbers = #tpu.dot_dimension_numbers<[1], [0], [0], [1], [0, 0, 1, 1], [], []>} : vector<64x32xbf16>, vector<32x128xbf16>, vector<64x128xf32> -> vector<64x128xf32>
    %c0_105 = arith.constant 0 : index
    %c0_106 = arith.constant 0 : index
    %455 = vector.load %arg12[%c0_105, %c0_106] : memref<64x32xbf16, #tpu.memory_space<vmem>>, vector<64x32xbf16>
    %c0_107 = arith.constant 0 : index
    %c0_108 = arith.constant 0 : index
    %456 = vector.load %arg7[%c0_107, %c0_108] : memref<32x128xbf16, #tpu.memory_space<vmem>>, vector<32x128xbf16>
    %cst_109 = arith.constant dense<0.000000e+00> : vector<64x128xf32>
    %457 = tpu.matmul %455, %456, %cst_109 {dimension_numbers = #tpu.dot_dimension_numbers<[1], [0], [0], [1], [0, 0, 1, 1], [], []>} : vector<64x32xbf16>, vector<32x128xbf16>, vector<64x128xf32> -> vector<64x128xf32>
    %458 = arith.addf %454, %457 : vector<64x128xf32>
    %c0_110 = arith.constant 0 : index
    %c0_111 = arith.constant 0 : index
    %459 = vector.load %arg8[%c0_110, %c0_111] : memref<1x128xf32, #tpu.memory_space<vmem>>, vector<1x128xf32>
    %460 = vector.broadcast %459 : vector<1x128xf32> to vector<64x128xf32>
    %461 = arith.addf %458, %460 : vector<64x128xf32>
    %c0_112 = arith.constant 0 : index
    %c0_113 = arith.constant 0 : index
    %c0_114 = arith.constant 0 : index
    %462 = vector.load %arg9[%c0_112, %c0_113, %c0_114] : memref<1x64x128xf32, #tpu.memory_space<vmem>>, vector<1x64x128xf32>
    %463 = vector.shape_cast %462 : vector<1x64x128xf32> to vector<64x128xf32>
    %464 = vector.shape_cast %461 : vector<64x128xf32> to vector<1x64x128xf32>
    tpu.vector_store %arg9[%c0_112, %c0_113, %c0_114], %464 {strides = array<i32>} : memref<1x64x128xf32, #tpu.memory_space<vmem>>, vector<1x64x128xf32>,
    return
  }
  func.func @transform_0(%arg0: i32) -> (i32, i32, i32) {
    %c0_i32 = arith.constant 0 : i32
    %c0_i32_0 = arith.constant 0 : i32
    %c0_i32_1 = arith.constant 0 : i32
    return %arg0, %c0_i32, %c0_i32_0 : i32, i32, i32
  }
  func.func @transform_1(%arg0: i32) -> (i32, i32) {
    %c0_i32 = arith.constant 0 : i32
    %c0_i32_0 = arith.constant 0 : i32
    %c0_i32_1 = arith.constant 0 : i32
    return %c0_i32, %c0_i32_0 : i32, i32
  }
  func.func @transform_2(%arg0: i32) -> (i32, i32) {
    %c0_i32 = arith.constant 0 : i32
    %c0_i32_0 = arith.constant 0 : i32
    %c0_i32_1 = arith.constant 0 : i32
    return %c0_i32, %c0_i32_0 : i32, i32
  }
  func.func @transform_3(%arg0: i32) -> (i32, i32) {
    %c0_i32 = arith.constant 0 : i32
    %c0_i32_0 = arith.constant 0 : i32
    %c0_i32_1 = arith.constant 0 : i32
    return %c0_i32, %c0_i32_0 : i32, i32
  }
  func.func @transform_4(%arg0: i32) -> (i32, i32) {
    %c0_i32 = arith.constant 0 : i32
    %c0_i32_0 = arith.constant 0 : i32
    %c0_i32_1 = arith.constant 0 : i32
    return %c0_i32, %c0_i32_0 : i32, i32
  }
  func.func @transform_5(%arg0: i32) -> (i32, i32) {
    %c0_i32 = arith.constant 0 : i32
    %c0_i32_0 = arith.constant 0 : i32
    %c0_i32_1 = arith.constant 0 : i32
    return %c0_i32, %c0_i32_0 : i32, i32
  }
  func.func @transform_6(%arg0: i32) -> (i32, i32) {
    %c0_i32 = arith.constant 0 : i32
    %c0_i32_0 = arith.constant 0 : i32
    %c0_i32_1 = arith.constant 0 : i32
    return %c0_i32, %c0_i32_0 : i32, i32
  }
  func.func @transform_7(%arg0: i32) -> (i32, i32) {
    %c0_i32 = arith.constant 0 : i32
    %c0_i32_0 = arith.constant 0 : i32
    %c0_i32_1 = arith.constant 0 : i32
    return %c0_i32, %c0_i32_0 : i32, i32
  }
  func.func @transform_8(%arg0: i32) -> (i32, i32, i32) {
    %c0_i32 = arith.constant 0 : i32
    %c0_i32_0 = arith.constant 0 : i32
    %c0_i32_1 = arith.constant 0 : i32
    return %arg0, %c0_i32, %c0_i32_0 : i32, i32, i32
  }
}

</mosaic_0001>

<bundles_post_ra>
// kernel: tpu_custom_call.1
= control target key start
LH: loop header
LB: loop body
LE: loop exit
PB: predicated region body
PF: predicated region fallthrough
CT: control target
= control target key end

     0   :  { %13 = vsyncpa [#allocation6], 0  ;;  %s2361_s0 = inlined_call_operand.vmem [shape: bf16[1,64,16], index: 0, kind: input, shape index: {}]   ;;  %s2362_s1 = inlined_call_operand.vmem [shape: bf16[16,256], index: 1, kind: input, shape index: {}]   ;;  %s2363_s2 = inlined_call_operand.vmem [shape: f32[1,256], index: 2, kind: input, shape index: {}]   ;;  %s2364_s3 = inlined_call_operand.vmem [shape: bf16[32,128], index: 3, kind: input, shape index: {}]   ;;  %s2365_s4 = inlined_call_operand.hbm [shape: bf16[32,128], index: 4, kind: input, shape index: {}]   ;;  %s2366_s5 = inlined_call_operand.hbm [shape: bf16[32,128], index: 5, kind: input, shape index: {}]   ;;  %s2367_s6 = inlined_call_operand.hbm [shape: bf16[32,128], index: 6, kind: input, shape index: {}]   ;;  %s2368_s7 = inlined_call_operand.vmem [shape: f32[1,128], index: 7, kind: input, shape index: {}]   ;;  %s2369_s8 = inlined_call_operand.hbm [shape: f32[1,64,128], index: 8, kind: output, shape index: {}]  }
   0x1   :  { %14 = vsyncpa [#allocation9], 0 }
   0x2   :  { %15 = vsyncpa [#allocation7], 0  ;;  %s41_s29 = sshll.u32 %s2366_s5, 4  ;;  %s1944_s30 = smov [#allocation8]   ;;  %s42_s29 = int_to_ptr.hbm [resolvable:$true] %s41_s29 }
   0x3   :  { %s43_s9 = sshll.u32 %s1944_s30, 4  ;;  %s28_s12 = sshll.u32 %s2365_s4, 4  ;;  %s44_s9 = int_to_ptr.vmem [resolvable:$true] %s43_s9  ;;  %s29_s12 = int_to_ptr.hbm [resolvable:$true] %s28_s12 }
   0x4   :  { %s1945_s13 = smov 64   ;;  %s1946_s14 = smov 4  }
   0x5   :  { %49 = dma.hbm_to_vmem [thread:$0]  %s42_s29, 256, %s44_s9, [#allocation9], %s1945_s13, %s1945_s13, %s1946_s14  }
   0x6   :  { %s1947_s15 = smov [#allocation5]   ;;  %s54_s5 = sshll.u32 %s2367_s6, 4  ;;  %s55_s5 = int_to_ptr.hbm [resolvable:$true] %s54_s5 }
   0x7   :  { %s30_s16 = sshll.u32 %s1947_s15, 4  ;;  %s1948_s19 = smov [#allocation10]   ;;  %s31_s16 = int_to_ptr.vmem [resolvable:$true] %s30_s16 }
   0x8   :  { %36 = dma.hbm_to_vmem [thread:$0]  %s29_s12, 256, %s31_s16, [#allocation6], %s1945_s13, %s1945_s13, %s1946_s14  }
   0x9   :  { %s56_s20 = sshll.u32 %s1948_s19, 4  ;;  %s57_s20 = int_to_ptr.vmem [resolvable:$true] %s56_s20 }
   0xa   :  { %62 = dma.hbm_to_vmem [thread:$0]  %s55_s5, 256, %s57_s20, [#allocation9], %s1945_s13, %s1945_s13, %s1946_s14  }
   0xb   :  { %1938 = dma.done.wait [#allocation6], 256  }
   0xc   :  { %1939 = vsyncadd [#allocation6], 4294967040 }
   0xd   :  { %1940 = dma.done.wait [#allocation9], 512  }
   0xe   :  { %1941 = vsyncadd [#allocation9], 4294966784  ;;  %v1563_v0 = vld [vmem:[%s2362_s1] sm:$0xf]  ;;  %v1684_v1 = vld [vmem:[%s2362_s1 + $0x4] sm:$0xf0] }
   0xf   :  { %v1683_v2 = vld [vmem:[%s2362_s1 + $0x4] sm:$0xf]  ;;  %v1564_v3 = vor.u32 %v1684_v1, %v1563_v0  ;;  %v1565_v4 = vld [vmem:[%s2362_s1 + $0x8] sm:$0xf0]  ;;  %v1681_v7 = vld [vmem:[%s2361_s0 + $0x10] sm:$0xff]  ;;  %vm124_vm0 = vcmask 130048  }
  0x10   :  { %v2026_v5 = vld [vmem:[#allocation5 + $0x8] sm:$0xff]  ;;  %v1568_v6 = vor.u32 %v1683_v2, %v1565_v4  ;;  %v1679_v8 = vld [vmem:[%s2361_s0] sm:$0xff]  ;;  %v1682_v12 = vld [vmem:[%s2361_s0 + $0x18] sm:$0xff]  ;;  %v1949_v13 = vmov 0   ;;  %vm231_vm9 = vcmask 261120   ;;  %s1524_s20 = sshll.u32 %s2369_s8, 4  ;;  %s1525_s20 = int_to_ptr.hbm [resolvable:$true] %s1524_s20 }
  0x11   :  { %1701 = vmatpush.bf16.msra.mxu2 %v1564_v3  ;;  %144 = vmatpush.bf16.msra.mxu0 %v1564_v3  ;;  %v2037_v9 = vld [vmem:[%s2364_s3 + $0x8] sm:$0xff]  ;;  %v2040_v10 = vld [vmem:[#allocation5] sm:$0xff]  ;;  %s1952_s4 = smov 128   ;;  %s1953_s21 = smov 8  }
  0x12   :  { %1702 = vmatpush.bf16.msra.mxu3 %v1568_v6  ;;  %173 = vmatpush.bf16.msra.mxu1 %v1568_v6  ;;  %v2046_v11 = vld [vmem:[%s2364_s3] sm:$0xff] }
  0x13   :  { %v88_v14 = vld [vmem:[%s2363_s2] sm:$0x3]  ;;  %s1950_s2 = smov 32  }
  0x14   :  { %1571 = vmatmul.msk.bf16.vlgmr.msra.gmra.mxu2 %vm124_vm0, %v1681_v7  ;;  %1569 = vmatmul.msk.bf16.vlgmr.msra.gmra.mxu0 %vm124_vm0, %v1679_v8  ;;  %v2078_v15 = vperm.slane %v88_v14, 0  ;;  %v2080_v16 = vperm.slane %v88_v14, 1 }
  0x15   :  { %241 = vmatpush.bf16.msrb.mxu2 %v2037_v9  ;;  %1575 = vmatmul.msk.bf16.vlgmr.msra.gmra.mxu3 %vm124_vm0, %v1681_v7 }
  0x16   :  { %266 = vmatpush.bf16.msrb.mxu3 %v2026_v5  ;;  %1573 = vmatmul.msk.bf16.vlgmr.msra.gmra.mxu1 %vm124_vm0, %v1679_v8 }
  0x17   :  { %826 = vmatpush.bf16.msrb.mxu1 %v2026_v5  ;;  %806 = vmatpush.bf16.msrb.mxu0 %v2037_v9 }
  0x19   :  { %242 = vmatpush.bf16.msrb.mxu2 %v2046_v11 }
  0x1a   :  { %267 = vmatpush.bf16.msrb.mxu3 %v2040_v10 }
  0x1b   :  { %827 = vmatpush.bf16.msrb.mxu1 %v2040_v10  ;;  %807 = vmatpush.bf16.msrb.mxu0 %v2046_v11 }
  0x1d   :  { %386 = vmatpush.bf16.msra.mxu2 %v2037_v9 }
  0x1e   :  { %406 = vmatpush.bf16.msra.mxu3 %v2026_v5 }
  0x1f   :  { %1094 = vmatpush.bf16.msra.mxu1 %v2026_v5  ;;  %1074 = vmatpush.bf16.msra.mxu0 %v2037_v9 }
  0x21   :  { %387 = vmatpush.bf16.msra.mxu2 %v2046_v11 }
  0x22   :  { %407 = vmatpush.bf16.msra.mxu3 %v2040_v10 }
  0x23   :  { %1095 = vmatpush.bf16.msra.mxu1 %v2040_v10  ;;  %1075 = vmatpush.bf16.msra.mxu0 %v2046_v11 }
  0x24   :  { %1572 = vmatmul.msk.bf16.gmra.mxu2 %vm124_vm0, %v1682_v12 }
  0x25   :  { %1576 = vmatmul.msk.bf16.gmra.mxu3 %vm124_vm0, %v1682_v12 }
  0x34   :  { %243 = vmatmul.bf16.vlgmr.msrb.gmra.mxu2 %v1949_v13 }
  0x35   :  { %268 = vmatmul.bf16.vlgmr.msrb.gmra.mxu3 %v1949_v13  ;;  %526 = vmatpush.bf16.msrb.mxu2 %v2037_v9 }
  0x36   :  { %546 = vmatpush.bf16.msrb.mxu3 %v2026_v5 }
  0x39   :  { %527 = vmatpush.bf16.msrb.mxu2 %v2046_v11 }
  0x3a   :  { %547 = vmatpush.bf16.msrb.mxu3 %v2040_v10 }
  0x91   :  { %v146_v17 = vpop.f32.mrf.mxu0 }
  0x92   :  { %v147_v18 = vadd.f32 %v146_v17, %v2078_v15 }
  0x93   :  { %v175_v19 = vpop.f32.mrf.mxu1 }
  0x94   :  { %v176_v20 = vadd.f32 %v175_v19, %v2080_v16 }
  0x96   :  { %v195_v21 = vpack.c.bf16 %v176_v20, %v147_v18 }
  0x97   :  { %v156_v22 = vpop.f32.mrf.mxu2 }
  0x98   :  { %203 = vst [vmem:[#allocation2] sm:$0xff] %v195_v21  ;;  %v157_v23 = vadd.f32 %v156_v22, %v2078_v15  ;;  %v185_v24 = vpop.f32.mrf.mxu3 }
  0x99   :  { %v186_v25 = vadd.f32 %v185_v24, %v2080_v16  ;;  %v148_v37 = vpop.f32.mrf.mxu0 }
  0x9a   :  { %v149_v39 = vadd.f32 %v148_v37, %v2078_v15 }
  0x9b   :  { %v199_v26 = vpack.c.bf16 %v186_v25, %v157_v23  ;;  %v177_v38 = vpop.f32.mrf.mxu1 }
  0x9c   :  { %v178_v40 = vadd.f32 %v177_v38, %v2080_v16 }
  0x9d   :  { %207 = vst [vmem:[#allocation2 + $0x20] sm:$0xff] %v199_v26 }
  0x9e   :  { %v196_v42 = vpack.c.bf16 %v178_v40, %v149_v39 }
  0x9f   :  { %v158_v27 = vpop.f32.mrf.mxu2  ;;  %v276_v46 = vld [vmem:[#allocation2] sm:$0xf] }
  0xa0   :  { %v159_v28 = vadd.f32 %v158_v27, %v2078_v15  ;;  %v187_v29 = vpop.f32.mrf.mxu3  ;;  %204 = vst [vmem:[#allocation2 + $0x8] sm:$0xff] %v196_v42  ;;  %v277_v48 = vunpack.c.l.bf16 %v276_v46 }
  0xa1   :  { %v188_v30 = vadd.f32 %v187_v29, %v2080_v16 }
  0xa3   :  { %v200_v31 = vpack.c.bf16 %v188_v30, %v159_v28 }
  0xa5   :  { %208 = vst [vmem:[#allocation2 + $0x28] sm:$0xff] %v200_v31 }
  0xa7   :  { %v161_v32 = vpop.f32.mrf.mxu2 }
  0xa8   :  { %v162_v33 = vadd.f32 %v161_v32, %v2078_v15  ;;  %v190_v34 = vpop.f32.mrf.mxu3 }
  0xa9   :  { %v191_v35 = vadd.f32 %v190_v34, %v2080_v16 }
  0xab   :  { %v201_v36 = vpack.c.bf16 %v191_v35, %v162_v33 }
  0xad   :  { %209 = vst [vmem:[#allocation2 + $0x30] sm:$0xff] %v201_v36 }
  0xaf   :  { %v163_v41 = vpop.f32.mrf.mxu2 }
  0xb0   :  { %v164_v43 = vadd.f32 %v163_v41, %v2078_v15  ;;  %v192_v44 = vpop.f32.mrf.mxu3 }
  0xb1   :  { %v193_v45 = vadd.f32 %v192_v44, %v2080_v16 }
  0xb3   :  { %v202_v47 = vpack.c.bf16 %v193_v45, %v164_v43 }
  0xb5   :  { %210 = vst [vmem:[#allocation2 + $0x38] sm:$0xff] %v202_v47 }
  0xb7   :  { %v244_v49 = vpop.f32.mrf.mxu2 }
  0xb8   :  { %v283_v50 = vadd.f32 %v277_v48, %v244_v49  ;;  %v269_v51 = vpop.f32.mrf.mxu3 }
  0xba   :  { %1714 = vtanh.f32 %v283_v50  ;;  %v1593_v59 = vmul.f32 -1.442695, %v283_v50 }
  0xbc   :  { %v281_v52 = vld [vmem:[#allocation2 + $0x3c] sm:$0xf] }
  0xbd   :  { %v282_v53 = vunpack.c.l.bf16 %v281_v52 }
  0xbf   :  { %v321_v54 = vadd.f32 %v282_v53, %v269_v51  ;;  %v246_v55 = vpop.f32.mrf.mxu2  ;;  %v421_v51 = vld [vmem:[#allocation2 + $0x34] sm:$0xf] }
  0xc0   :  { %v1715_v56 = vpop.eup %1714  ;;  %v271_v57 = vpop.f32.mrf.mxu3  ;;  %v422_v52 = vunpack.c.l.bf16 %v421_v51 }
  0xc1   :  { %1716 = vtanh.f32 %v321_v54  ;;  %306 = vrot.lane.b32.xlu1 %v1715_v56, %s1950_s2  ;;  %v1594_v60 = vmul.f32 -1.442695, %v321_v54  ;;  %v416_v57 = vld [vmem:[#allocation2 + $0x8] sm:$0xf] }
  0xc2   :  { %1718 = vpow2.f32 %v1593_v59 }
  0xc3   :  { %1720 = vpow2.f32 %v1594_v60 }
  0xc7   :  { %v1717_v58 = vpop.eup %1716 }
  0xc8   :  { %344 = vrot.lane.b32.xlu0 %v1717_v58, %s1950_s2  ;;  %v1719_v61 = vpop.eup %1718  ;;  %v417_v58 = vunpack.c.l.bf16 %v416_v57 }
  0xc9   :  { %v287_v62 = vadd.f32 1.0, %v1719_v61  ;;  %v1721_v63 = vpop.eup %1720 }
  0xca   :  { %v325_v0 = vadd.f32 1.0, %v1721_v63 }
  0xcb   :  { %1722 = vrcp.f32 %v287_v62  ;;  %vm293_vm1 = vweird.f32 %v287_v62  ;;  %v299_v8 = vand.u32 2147483648, %v287_v62  ;;  %v297_v14 = vand.u32 2147483647, %v287_v62 }
  0xcc   :  { %1724 = vrcp.f32 %v325_v0  ;;  %v337_v24 = vand.u32 2147483648, %v325_v0  ;;  %vm331_vm6 = vweird.f32 %v325_v0  ;;  %v335_v25 = vand.u32 2147483647, %v325_v0 }
  0xcd   :  { %v300_v17 = vor.u32 1.1754944e-38, %v299_v8  ;;  %vm298_vm4 = vcmp.eq.f32.partialorder %v297_v14, 8.507059e+37 }
  0xce   :  { %v338_v27 = vor.u32 1.1754944e-38, %v337_v24  ;;  %vm336_vm8 = vcmp.eq.f32.partialorder %v335_v25, 8.507059e+37 }
  0xd1   :  { %v1723_v1 = vpop.eup %1722 }
  0xd2   :  { %v289_v2 = vmul.f32 %v1723_v1, %v287_v62  ;;  %v1725_v3 = vpop.eup %1724  ;;  %vm294_vm2 = vweird.f32 %v1723_v1 }
  0xd3   :  { %v327_v6 = vmul.f32 %v1725_v3, %v325_v0  ;;  %vm295_vm3 = vmor %vm293_vm1, %vm294_vm2  ;;  %vm332_vm5 = vweird.f32 %v1725_v3 }
  0xd4   :  { %v290_v4 = vsub.f32 1.0, %v289_v2  ;;  %vm333_vm7 = vmor %vm331_vm6, %vm332_vm5 }
  0xd5   :  { %v328_v12 = vsub.f32 1.0, %v327_v6 }
  0xd6   :  { %v291_v7 = vmul.f32 %v1723_v1, %v290_v4 }
  0xd7   :  { %v329_v18 = vmul.f32 %v1725_v3, %v328_v12 }
  0xd8   :  { %v292_v13 = vadd.f32 %v1723_v1, %v291_v7 }
  0xd9   :  { %v330_v22 = vadd.f32 %v1725_v3, %v329_v18 }
  0xda   :  { %v296_v19 = vsel %vm295_vm3, %v1723_v1, %v292_v13 }
  0xdb   :  { %v301_v21 = vsel %vm298_vm4, %v300_v17, %v296_v19  ;;  %v334_v26 = vsel %vm333_vm7, %v1725_v3, %v330_v22 }
  0xdc   :  { %v339_v29 = vsel %vm336_vm8, %v338_v27, %v334_v26  ;;  %v304_v31 = vmul.f32 0.0, %v301_v21 }
  0xdd   :  { %v342_v34 = vmul.f32 0.0, %v339_v29 }
 0x133   :  { %v307_v20 = vpop.permute.xlu1 %306 }
 0x134   :  { %v309_v23 = vmul.f32 %v307_v20, %v301_v21 }
 0x136   :  { %311 = vrot.lane.b32.xlu1 %v309_v23, %s1950_s2 }
 0x13a   :  { %v345_v28 = vpop.permute.xlu0 %344 }
 0x13b   :  { %v347_v30 = vmul.f32 %v345_v28, %v339_v29 }
 0x13d   :  { %349 = vrot.lane.b32.xlu0 %v347_v30, %s1950_s2 }
 0x1a8   :  { %v312_v32 = vpop.permute.xlu1 %311 }
 0x1a9   :  { %v2098_v33 = vadd.f32 %v312_v32, %v304_v31 }
 0x1ab   :  { %1726 = vtanh.f32 %v2098_v33 }
 0x1af   :  { %v350_v35 = vpop.permute.xlu0 %349 }
 0x1b0   :  { %v2101_v36 = vadd.f32 %v350_v35, %v342_v34 }
 0x1b1   :  { %v1727_v37 = vpop.eup %1726 }
 0x1b2   :  { %1728 = vtanh.f32 %v2101_v36  ;;  %317 = vrot.lane.b32.xlu0 %v1727_v37, %s1950_s2 }
 0x1b8   :  { %v1729_v38 = vpop.eup %1728 }
 0x1b9   :  { %355 = vrot.lane.b32.xlu2 %v1729_v38, %s1950_s2 }
 0x213   :  { %v356_v39 = vpop.permute.xlu2 %355 }
 0x214   :  { %v358_v40 = vmul.f32 %v356_v39, %v339_v29 }
 0x216   :  { %v2106_v41 = vpack.c.bf16 %v358_v40, %v358_v40 }
 0x218   :  { %v393_v42 = vunpack.c.l.b16 %v2106_v41 }
 0x21a   :  { %v394_v43 = vpack.c.b16 %v393_v42, %v393_v42 }
 0x21c   :  { %395 = vrot.lane.b32.xlu2 %v394_v43, %s1945_s13 }
 0x224   :  { %v318_v44 = vpop.permute.xlu0 %317 }
 0x225   :  { %v320_v45 = vmul.f32 %v318_v44, %v301_v21 }
 0x227   :  { %v2110_v46 = vpack.c.bf16 %v320_v45, %v320_v45 }
 0x229   :  { %v373_v47 = vunpack.c.l.b16 %v2110_v46 }
 0x22b   :  { %v374_v48 = vpack.c.b16 %v373_v47, %v373_v47 }
 0x22d   :  { %375 = vrot.lane.b32.xlu1 %v374_v48, %s1945_s13 }
 0x276   :  { %v396_v49 = vpop.permute.xlu2 %395 }
 0x277   :  { %1596 = vmatmul.msk.bf16.vlgmr.msra.gmra.mxu3 %vm231_vm9, %v396_v49 }
 0x278   :  { %686 = vmatpush.bf16.msra.mxu3 %v2026_v5 }
 0x27c   :  { %687 = vmatpush.bf16.msra.mxu3 %v2040_v10 }
 0x29f   :  { %v376_v50 = vpop.permute.xlu1 %375 }
 0x2a0   :  { %1595 = vmatmul.msk.bf16.vlgmr.msra.gmra.mxu2 %vm231_vm9, %v376_v50 }
 0x2a1   :  { %666 = vmatpush.bf16.msra.mxu2 %v2037_v9 }
 0x2a5   :  { %667 = vmatpush.bf16.msra.mxu2 %v2046_v11 }
 0x2fa   :  { %v409_v53 = vpop.f32.mrf.mxu3 }
 0x2fb   :  { %v461_v54 = vadd.f32 %v422_v52, %v409_v53 }
 0x2fd   :  { %1730 = vtanh.f32 %v461_v54  ;;  %v1598_v63 = vmul.f32 -1.442695, %v461_v54 }
 0x302   :  { %v411_v55 = vpop.f32.mrf.mxu3 }
 0x303   :  { %v1731_v56 = vpop.eup %1730  ;;  %v1680_v55 = vld [vmem:[%s2361_s0 + $0x8] sm:$0xff] }
 0x304   :  { %484 = vrot.lane.b32.xlu2 %v1731_v56, %s1950_s2  ;;  %1570 = vmatmul.msk.bf16.gmra.mxu0 %vm124_vm0, %v1680_v55 }
 0x305   :  { %1574 = vmatmul.msk.bf16.gmra.mxu1 %vm124_vm0, %v1680_v55 }
 0x323   :  { %v389_v59 = vpop.f32.mrf.mxu2 }
 0x324   :  { %v423_v60 = vadd.f32 %v417_v58, %v389_v59 }
 0x326   :  { %1732 = vtanh.f32 %v423_v60  ;;  %v1597_v20 = vmul.f32 -1.442695, %v423_v60 }
 0x327   :  { %1734 = vpow2.f32 %v1598_v63  ;;  %v561_v63 = vld [vmem:[#allocation2 + $0x2c] sm:$0xf] }
 0x32b   :  { %v391_v61 = vpop.f32.mrf.mxu2 }
 0x32c   :  { %v1733_v62 = vpop.eup %1732 }
 0x32d   :  { %446 = vrot.lane.b32.xlu1 %v1733_v62, %s1950_s2  ;;  %v1735_v0 = vpop.eup %1734 }
 0x32e   :  { %v465_v1 = vadd.f32 1.0, %v1735_v0  ;;  %v562_v0 = vunpack.c.l.bf16 %v561_v63 }
 0x330   :  { %1736 = vrcp.f32 %v465_v1  ;;  %v477_v8 = vand.u32 2147483648, %v465_v1  ;;  %vm471_vm11 = vweird.f32 %v465_v1  ;;  %v475_v12 = vand.u32 2147483647, %v465_v1 }
 0x331   :  { %1738 = vpow2.f32 %v1597_v20 }
 0x332   :  { %v478_v14 = vor.u32 1.1754944e-38, %v477_v8  ;;  %vm476_vm13 = vcmp.eq.f32.partialorder %v475_v12, 8.507059e+37 }
 0x336   :  { %v1737_v2 = vpop.eup %1736 }
 0x337   :  { %v467_v3 = vmul.f32 %v1737_v2, %v465_v1  ;;  %vm472_vm10 = vweird.f32 %v1737_v2  ;;  %v1739_v21 = vpop.eup %1738 }
 0x338   :  { %vm473_vm12 = vmor %vm471_vm11, %vm472_vm10  ;;  %v427_v22 = vadd.f32 1.0, %v1739_v21 }
 0x339   :  { %v468_v4 = vsub.f32 1.0, %v467_v3 }
 0x33a   :  { %1740 = vrcp.f32 %v427_v22  ;;  %v439_v28 = vand.u32 2147483648, %v427_v22  ;;  %vm433_vm15 = vweird.f32 %v427_v22  ;;  %v437_v29 = vand.u32 2147483647, %v427_v22 }
 0x33b   :  { %v469_v6 = vmul.f32 %v1737_v2, %v468_v4 }
 0x33c   :  { %v440_v31 = vor.u32 1.1754944e-38, %v439_v28  ;;  %vm438_vm2 = vcmp.eq.f32.partialorder %v437_v29, 8.507059e+37 }
 0x33d   :  { %v470_v7 = vadd.f32 %v1737_v2, %v469_v6 }
 0x33f   :  { %v474_v13 = vsel %vm473_vm12, %v1737_v2, %v470_v7 }
 0x340   :  { %v479_v18 = vsel %vm476_vm13, %v478_v14, %v474_v13  ;;  %v1741_v23 = vpop.eup %1740 }
 0x341   :  { %v429_v24 = vmul.f32 %v1741_v23, %v427_v22  ;;  %vm434_vm14 = vweird.f32 %v1741_v23  ;;  %v482_v37 = vmul.f32 %v479_v18, %v2101_v36 }
 0x342   :  { %vm435_vm1 = vmor %vm433_vm15, %vm434_vm14 }
 0x343   :  { %v430_v25 = vsub.f32 1.0, %v429_v24 }
 0x345   :  { %v431_v26 = vmul.f32 %v1741_v23, %v430_v25 }
 0x347   :  { %v432_v27 = vadd.f32 %v1741_v23, %v431_v26 }
 0x349   :  { %v436_v30 = vsel %vm435_vm1, %v1741_v23, %v432_v27 }
 0x34a   :  { %v441_v34 = vsel %vm438_vm2, %v440_v31, %v436_v30 }
 0x34b   :  { %v444_v42 = vmul.f32 %v441_v34, %v2098_v33 }
 0x35e   :  { %v485_v17 = vpop.permute.xlu2 %484 }
 0x35f   :  { %v487_v19 = vmul.f32 %v485_v17, %v479_v18 }
 0x361   :  { %489 = vrot.lane.b32.xlu0 %v487_v19, %s1950_s2 }
 0x381   :  { %v151_v58 = vpop.f32.mrf.mxu0 }
 0x382   :  { %v180_v59 = vpop.f32.mrf.mxu1  ;;  %v152_v60 = vadd.f32 %v151_v58, %v2078_v15 }
 0x383   :  { %v181_v61 = vadd.f32 %v180_v59, %v2080_v16 }
 0x385   :  { %v197_v62 = vpack.c.bf16 %v181_v61, %v152_v60 }
 0x387   :  { %205 = vst [vmem:[#allocation2 + $0x10] sm:$0xff] %v197_v62 }
 0x389   :  { %v153_v1 = vpop.f32.mrf.mxu0 }
 0x38a   :  { %v182_v2 = vpop.f32.mrf.mxu1  ;;  %v154_v4 = vadd.f32 %v153_v1, %v2078_v15 }
 0x38b   :  { %v183_v6 = vadd.f32 %v182_v2, %v2080_v16 }
 0x38d   :  { %v198_v8 = vpack.c.bf16 %v183_v6, %v154_v4 }
 0x38e   :  { %v2158_v14 = vld [vmem:[#allocation2 + $0x10] sm:$0xff]  }
 0x38f   :  { %206 = vst [vmem:[#allocation2 + $0x18] sm:$0xff] %v198_v8  ;;  %v557_v17 = vunpack.c.l.bf16 %v2158_v14 }
 0x39f   :  { %v447_v32 = vpop.permute.xlu1 %446 }
 0x3a0   :  { %v449_v35 = vmul.f32 %v447_v32, %v441_v34 }
 0x3a2   :  { %451 = vrot.lane.b32.xlu2 %v449_v35, %s1950_s2 }
 0x3d3   :  { %v490_v38 = vpop.permute.xlu0 %489 }
 0x3d4   :  { %v2125_v39 = vadd.f32 %v490_v38, %v482_v37 }
 0x3d6   :  { %1742 = vtanh.f32 %v2125_v39 }
 0x3dc   :  { %v1743_v40 = vpop.eup %1742 }
 0x3dd   :  { %495 = vrot.lane.b32.xlu0 %v1743_v40, %s1950_s2 }
 0x3fc   :  { %v452_v43 = vpop.permute.xlu2 %451 }
 0x3fd   :  { %v2130_v44 = vadd.f32 %v452_v43, %v444_v42 }
 0x3ff   :  { %1744 = vtanh.f32 %v2130_v44 }
 0x405   :  { %v1745_v45 = vpop.eup %1744 }
 0x406   :  { %457 = vrot.lane.b32.xlu2 %v1745_v45, %s1950_s2 }
 0x44f   :  { %v496_v47 = vpop.permute.xlu0 %495 }
 0x450   :  { %v498_v36 = vmul.f32 %v496_v47, %v479_v18 }
 0x452   :  { %v2134_v48 = vpack.c.bf16 %v498_v36, %v498_v36 }
 0x454   :  { %v533_v49 = vunpack.c.l.b16 %v2134_v48 }
 0x456   :  { %v534_v50 = vpack.c.b16 %v533_v49, %v533_v49 }
 0x458   :  { %535 = vrot.lane.b32.xlu1 %v534_v50, %s1945_s13 }
 0x460   :  { %v458_v51 = vpop.permute.xlu2 %457 }
 0x461   :  { %v460_v52 = vmul.f32 %v458_v51, %v441_v34 }
 0x463   :  { %v2138_v33 = vpack.c.bf16 %v460_v52, %v460_v52 }
 0x465   :  { %v513_v53 = vunpack.c.l.b16 %v2138_v33 }
 0x467   :  { %v514_v54 = vpack.c.b16 %v513_v53, %v513_v53 }
 0x469   :  { %515 = vrot.lane.b32.xlu0 %v514_v54, %s1945_s13 }
 0x4ca   :  { %v536_v56 = vpop.permute.xlu1 %535 }
 0x4cb   :  { %1600 = vmatmul.msk.bf16.vlgmr.msrb.gmra.mxu3 %vm231_vm9, %v536_v56 }
 0x4cc   :  { %960 = vmatpush.bf16.msrb.mxu3 %v2026_v5 }
 0x4d0   :  { %961 = vmatpush.bf16.msrb.mxu3 %v2040_v10 }
 0x4db   :  { %v516_v57 = vpop.permute.xlu0 %515 }
 0x4dc   :  { %1599 = vmatmul.msk.bf16.vlgmr.msrb.gmra.mxu2 %vm231_vm9, %v516_v57 }
 0x4dd   :  { %940 = vmatpush.bf16.msrb.mxu2 %v2037_v9 }
 0x4e1   :  { %941 = vmatpush.bf16.msrb.mxu2 %v2046_v11 }
 0x54e   :  { %v549_v3 = vpop.f32.mrf.mxu3 }
 0x54f   :  { %v601_v7 = vadd.f32 %v562_v0, %v549_v3 }
 0x551   :  { %1746 = vtanh.f32 %v601_v7  ;;  %v1602_v15 = vmul.f32 -1.442695, %v601_v7 }
 0x556   :  { %v551_v12 = vpop.f32.mrf.mxu3 }
 0x557   :  { %v1747_v13 = vpop.eup %1746 }
 0x558   :  { %624 = vrot.lane.b32.xlu1 %v1747_v13, %s1950_s2 }
 0x55f   :  { %v529_v18 = vpop.f32.mrf.mxu2 }
 0x560   :  { %v563_v19 = vadd.f32 %v557_v17, %v529_v18  ;;  %v2188_v17 = vld [vmem:[#allocation2 + $0x24] sm:$0xff]  }
 0x561   :  { %v702_v18 = vunpack.c.l.bf16 %v2188_v17 }
 0x562   :  { %1748 = vtanh.f32 %v563_v19  ;;  %v1601_v23 = vmul.f32 -1.442695, %v563_v19 }
 0x563   :  { %1750 = vpow2.f32 %v1602_v15 }
 0x567   :  { %v531_v20 = vpop.f32.mrf.mxu2 }
 0x568   :  { %v1749_v21 = vpop.eup %1748 }
 0x569   :  { %586 = vrot.lane.b32.xlu0 %v1749_v21, %s1950_s2  ;;  %v1751_v16 = vpop.eup %1750 }
 0x56a   :  { %v605_v22 = vadd.f32 1.0, %v1751_v16 }
 0x56c   :  { %1752 = vrcp.f32 %v605_v22  ;;  %v617_v31 = vand.u32 2147483648, %v605_v22  ;;  %vm611_vm3 = vweird.f32 %v605_v22  ;;  %v615_v34 = vand.u32 2147483647, %v605_v22 }
 0x56d   :  { %1754 = vpow2.f32 %v1601_v23 }
 0x56e   :  { %v618_v37 = vor.u32 1.1754944e-38, %v617_v31  ;;  %vm616_vm5 = vcmp.eq.f32.partialorder %v615_v34, 8.507059e+37 }
 0x572   :  { %v1753_v24 = vpop.eup %1752 }
 0x573   :  { %v607_v25 = vmul.f32 %v1753_v24, %v605_v22  ;;  %v1755_v26 = vpop.eup %1754  ;;  %vm612_vm0 = vweird.f32 %v1753_v24 }
 0x574   :  { %v567_v27 = vadd.f32 1.0, %v1755_v26  ;;  %vm613_vm4 = vmor %vm611_vm3, %vm612_vm0 }
 0x575   :  { %v608_v28 = vsub.f32 1.0, %v607_v25 }
 0x576   :  { %1756 = vrcp.f32 %v567_v27  ;;  %v579_v49 = vand.u32 2147483648, %v567_v27  ;;  %vm573_vm7 = vweird.f32 %v567_v27  ;;  %v577_v50 = vand.u32 2147483647, %v567_v27 }
 0x577   :  { %v609_v29 = vmul.f32 %v1753_v24, %v608_v28 }
 0x578   :  { %v580_v52 = vor.u32 1.1754944e-38, %v579_v49  ;;  %vm578_vm10 = vcmp.eq.f32.partialorder %v577_v50, 8.507059e+37 }
 0x579   :  { %v610_v30 = vadd.f32 %v1753_v24, %v609_v29 }
 0x57b   :  { %v614_v35 = vsel %vm613_vm4, %v1753_v24, %v610_v30 }
 0x57c   :  { %v1757_v32 = vpop.eup %1756  ;;  %v619_v42 = vsel %vm616_vm5, %v618_v37, %v614_v35 }
 0x57d   :  { %v569_v38 = vmul.f32 %v1757_v32, %v567_v27  ;;  %vm574_vm6 = vweird.f32 %v1757_v32  ;;  %v622_v56 = vmul.f32 %v619_v42, %v2125_v39 }
 0x57e   :  { %vm575_vm8 = vmor %vm573_vm7, %vm574_vm6 }
 0x57f   :  { %v570_v45 = vsub.f32 1.0, %v569_v38 }
 0x581   :  { %v571_v47 = vmul.f32 %v1757_v32, %v570_v45 }
 0x583   :  { %v572_v36 = vadd.f32 %v1757_v32, %v571_v47 }
 0x585   :  { %v576_v51 = vsel %vm575_vm8, %v1757_v32, %v572_v36 }
 0x586   :  { %v581_v54 = vsel %vm578_vm10, %v580_v52, %v576_v51 }
 0x587   :  { %v584_v60 = vmul.f32 %v581_v54, %v2130_v44 }
 0x5ca   :  { %v625_v40 = vpop.permute.xlu1 %624 }
 0x5cb   :  { %v627_v43 = vmul.f32 %v625_v40, %v619_v42 }
 0x5cd   :  { %629 = vrot.lane.b32.xlu2 %v627_v43, %s1950_s2 }
 0x5db   :  { %v587_v53 = vpop.permute.xlu0 %586 }
 0x5dc   :  { %v589_v55 = vmul.f32 %v587_v53, %v581_v54 }
 0x5de   :  { %591 = vrot.lane.b32.xlu1 %v589_v55, %s1950_s2 }
 0x627   :  { %v630_v57 = vpop.permute.xlu2 %629 }
 0x628   :  { %v2165_v58 = vadd.f32 %v630_v57, %v622_v56 }
 0x62a   :  { %1758 = vtanh.f32 %v2165_v58 }
 0x630   :  { %v1759_v59 = vpop.eup %1758 }
 0x631   :  { %635 = vrot.lane.b32.xlu2 %v1759_v59, %s1950_s2 }
 0x650   :  { %v592_v61 = vpop.permute.xlu1 %591 }
 0x651   :  { %v2170_v62 = vadd.f32 %v592_v61, %v584_v60 }
 0x653   :  { %1760 = vtanh.f32 %v2170_v62 }
 0x659   :  { %v1761_v63 = vpop.eup %1760 }
 0x65a   :  { %597 = vrot.lane.b32.xlu1 %v1761_v63, %s1950_s2 }
 0x68b   :  { %v636_v0 = vpop.permute.xlu2 %635 }
 0x68c   :  { %v638_v39 = vmul.f32 %v636_v0, %v619_v42 }
 0x68e   :  { %v2174_v1 = vpack.c.bf16 %v638_v39, %v638_v39 }
 0x690   :  { %v673_v2 = vunpack.c.l.b16 %v2174_v1 }
 0x692   :  { %v674_v3 = vpack.c.b16 %v673_v2, %v673_v2 }
 0x694   :  { %675 = vrot.lane.b32.xlu0 %v674_v3, %s1945_s13 }
 0x6cc   :  { %v598_v4 = vpop.permute.xlu1 %597 }
 0x6cd   :  { %v600_v6 = vmul.f32 %v598_v4, %v581_v54 }
 0x6cf   :  { %v2178_v44 = vpack.c.bf16 %v600_v6, %v600_v6 }
 0x6d1   :  { %v653_v7 = vunpack.c.l.b16 %v2178_v44 }
 0x6d3   :  { %v654_v8 = vpack.c.b16 %v653_v7, %v653_v7 }
 0x6d5   :  { %655 = vrot.lane.b32.xlu2 %v654_v8, %s1945_s13 }
 0x706   :  { %v676_v12 = vpop.permute.xlu0 %675 }
 0x707   :  { %1604 = vmatmul.msk.bf16.vlgmr.msra.gmra.mxu3 %vm231_vm9, %v676_v12 }
 0x708   :  { %1228 = vmatpush.bf16.msra.mxu3 %v2026_v5  ;;  %v2192_v5 = vld [vmem:[#allocation2 + $0x18] sm:$0xff]  }
 0x70c   :  { %1229 = vmatpush.bf16.msra.mxu3 %v2040_v10  ;;  %v697_v10 = vunpack.c.l.bf16 %v2192_v5 }
 0x72f   :  { %v656_v13 = vpop.permute.xlu2 %655 }
 0x730   :  { %1603 = vmatmul.msk.bf16.vlgmr.msra.gmra.mxu2 %vm231_vm9, %v656_v13 }
 0x731   :  { %1208 = vmatpush.bf16.msra.mxu2 %v2037_v9 }
 0x735   :  { %1209 = vmatpush.bf16.msra.mxu2 %v2046_v11 }
 0x78a   :  { %v689_v19 = vpop.f32.mrf.mxu3 }
 0x78b   :  { %v741_v20 = vadd.f32 %v702_v18, %v689_v19 }
 0x78d   :  { %1762 = vtanh.f32 %v741_v20  ;;  %v1606_v23 = vmul.f32 -1.442695, %v741_v20 }
 0x792   :  { %v691_v21 = vpop.f32.mrf.mxu3 }
 0x793   :  { %v1763_v15 = vpop.eup %1762 }
 0x794   :  { %764 = vrot.lane.b32.xlu0 %v1763_v15, %s1950_s2 }
 0x7b3   :  { %v669_v16 = vpop.f32.mrf.mxu2 }
 0x7b4   :  { %v703_v22 = vadd.f32 %v697_v10, %v669_v16  ;;  %v836_v10 = vunpack.c.h.bf16 %v2192_v5 }
 0x7b6   :  { %1764 = vtanh.f32 %v703_v22  ;;  %v1605_v26 = vmul.f32 -1.442695, %v703_v22 }
 0x7b7   :  { %1766 = vpow2.f32 %v1606_v23  ;;  %v833_v23 = vld [vmem:[#allocation2 + $0x20] sm:$0xf] }
 0x7bb   :  { %v671_v9 = vpop.f32.mrf.mxu2 }
 0x7bc   :  { %v1765_v11 = vpop.eup %1764 }
 0x7bd   :  { %726 = vrot.lane.b32.xlu2 %v1765_v11, %s1950_s2  ;;  %v1767_v24 = vpop.eup %1766 }
 0x7be   :  { %v745_v25 = vadd.f32 1.0, %v1767_v24  ;;  %v834_v24 = vunpack.c.l.bf16 %v833_v23 }
 0x7c0   :  { %1768 = vrcp.f32 %v745_v25  ;;  %v757_v35 = vand.u32 2147483648, %v745_v25  ;;  %vm751_vm12 = vweird.f32 %v745_v25  ;;  %v755_v38 = vand.u32 2147483647, %v745_v25 }
 0x7c1   :  { %1770 = vpow2.f32 %v1605_v26 }
 0x7c2   :  { %v758_v42 = vor.u32 1.1754944e-38, %v757_v35  ;;  %vm756_vm14 = vcmp.eq.f32.partialorder %v755_v38, 8.507059e+37 }
 0x7c6   :  { %v1769_v27 = vpop.eup %1768 }
 0x7c7   :  { %v747_v28 = vmul.f32 %v1769_v27, %v745_v25  ;;  %v1771_v29 = vpop.eup %1770  ;;  %vm752_vm11 = vweird.f32 %v1769_v27 }
 0x7c8   :  { %v707_v30 = vadd.f32 1.0, %v1771_v29  ;;  %vm753_vm13 = vmor %vm751_vm12, %vm752_vm11 }
 0x7c9   :  { %v748_v31 = vsub.f32 1.0, %v747_v28 }
 0x7ca   :  { %1772 = vrcp.f32 %v707_v30  ;;  %v719_v52 = vand.u32 2147483648, %v707_v30  ;;  %vm713_vm1 = vweird.f32 %v707_v30  ;;  %v717_v53 = vand.u32 2147483647, %v707_v30 }
 0x7cb   :  { %v749_v32 = vmul.f32 %v1769_v27, %v748_v31 }
 0x7cc   :  { %v720_v55 = vor.u32 1.1754944e-38, %v719_v52  ;;  %vm718_vm0 = vcmp.eq.f32.partialorder %v717_v53, 8.507059e+37 }
 0x7cd   :  { %v750_v34 = vadd.f32 %v1769_v27, %v749_v32 }
 0x7cf   :  { %v754_v40 = vsel %vm753_vm13, %v1769_v27, %v750_v34 }
 0x7d0   :  { %v1773_v37 = vpop.eup %1772  ;;  %v759_v47 = vsel %vm756_vm14, %v758_v42, %v754_v40 }
 0x7d1   :  { %v709_v43 = vmul.f32 %v1773_v37, %v707_v30  ;;  %vm714_vm15 = vweird.f32 %v1773_v37  ;;  %v762_v60 = vmul.f32 %v759_v47, %v2165_v58 }
 0x7d2   :  { %vm715_vm2 = vmor %vm713_vm1, %vm714_vm15 }
 0x7d3   :  { %v710_v49 = vsub.f32 1.0, %v709_v43 }
 0x7d5   :  { %v711_v50 = vmul.f32 %v1773_v37, %v710_v49 }
 0x7d7   :  { %v712_v51 = vadd.f32 %v1773_v37, %v711_v50 }
 0x7d9   :  { %v716_v54 = vsel %vm715_vm2, %v1773_v37, %v712_v51 }
 0x7da   :  { %v721_v57 = vsel %vm718_vm0, %v720_v55, %v716_v54 }
 0x7db   :  { %v724_v39 = vmul.f32 %v721_v57, %v2170_v62 }
 0x806   :  { %v765_v45 = vpop.permute.xlu0 %764 }
 0x807   :  { %v767_v36 = vmul.f32 %v765_v45, %v759_v47 }
 0x809   :  { %769 = vrot.lane.b32.xlu1 %v767_v36, %s1950_s2 }
 0x817   :  { %v727_v56 = vpop.permute.xlu2 %726 }
 0x818   :  { %v729_v59 = vmul.f32 %v727_v56, %v721_v57 }
 0x81a   :  { %731 = vrot.lane.b32.xlu0 %v729_v59, %s1950_s2 }
 0x87b   :  { %v770_v61 = vpop.permute.xlu1 %769 }
 0x87c   :  { %v2199_v63 = vadd.f32 %v770_v61, %v762_v60 }
 0x87e   :  { %1774 = vtanh.f32 %v2199_v63 }
 0x884   :  { %v1775_v0 = vpop.eup %1774 }
 0x885   :  { %775 = vrot.lane.b32.xlu1 %v1775_v0, %s1950_s2 }
 0x88c   :  { %v732_v2 = vpop.permute.xlu0 %731 }
 0x88d   :  { %v2204_v3 = vadd.f32 %v732_v2, %v724_v39 }
 0x88f   :  { %1776 = vtanh.f32 %v2204_v3 }
 0x895   :  { %v1777_v4 = vpop.eup %1776 }
 0x896   :  { %737 = vrot.lane.b32.xlu0 %v1777_v4, %s1950_s2 }
 0x8f7   :  { %v776_v6 = vpop.permute.xlu1 %775 }
 0x8f8   :  { %v778_v58 = vmul.f32 %v776_v6, %v759_v47 }
 0x8fa   :  { %v2208_v7 = vpack.c.bf16 %v778_v58, %v778_v58 }
 0x8fc   :  { %v813_v8 = vunpack.c.l.b16 %v2208_v7 }
 0x8fe   :  { %v814_v12 = vpack.c.b16 %v813_v8, %v813_v8 }
 0x900   :  { %815 = vrot.lane.b32.xlu2 %v814_v12, %s1945_s13 }
 0x908   :  { %v738_v13 = vpop.permute.xlu0 %737 }
 0x909   :  { %v740_v18 = vmul.f32 %v738_v13, %v721_v57 }
 0x90b   :  { %v2212_v62 = vpack.c.bf16 %v740_v18, %v740_v18 }
 0x90d   :  { %v793_v19 = vunpack.c.l.b16 %v2212_v62 }
 0x90f   :  { %v794_v20 = vpack.c.b16 %v793_v19, %v793_v19 }
 0x911   :  { %795 = vrot.lane.b32.xlu1 %v794_v20, %s1945_s13 }
 0x95a   :  { %v816_v21 = vpop.permute.xlu2 %815 }
 0x95b   :  { %1608 = vmatmul.msk.bf16.vlgmr.msrb.gmra.mxu1 %vm231_vm9, %v816_v21 }
 0x983   :  { %v796_v15 = vpop.permute.xlu1 %795 }
 0x984   :  { %1607 = vmatmul.msk.bf16.vlgmr.msrb.gmra.mxu0 %vm231_vm9, %v796_v15 }
 0x9d8   :  { %v829_v16 = vpop.f32.mrf.mxu1 }
 0x9d9   :  { %v875_v22 = vadd.f32 %v836_v10, %v829_v16 }
 0x9db   :  { %1778 = vtanh.f32 %v875_v22  ;;  %v1610_v29 = vmul.f32 -1.442695, %v875_v22 }
 0x9e0   :  { %v831_v9 = vpop.f32.mrf.mxu1 }
 0x9e1   :  { %v1779_v11 = vpop.eup %1778 }
 0x9e2   :  { %898 = vrot.lane.b32.xlu2 %v1779_v11, %s1950_s2 }
 0xa01   :  { %v809_v25 = vpop.f32.mrf.mxu0 }
 0xa02   :  { %v837_v26 = vadd.f32 %v834_v24, %v809_v25  ;;  %v970_v25 = vunpack.c.h.bf16 %v2158_v14 }
 0xa04   :  { %1780 = vtanh.f32 %v837_v26  ;;  %v1609_v49 = vmul.f32 -1.442695, %v837_v26 }
 0xa05   :  { %1782 = vpow2.f32 %v1610_v29 }
 0xa09   :  { %v811_v27 = vpop.f32.mrf.mxu0 }
 0xa0a   :  { %v1781_v28 = vpop.eup %1780 }
 0xa0b   :  { %860 = vrot.lane.b32.xlu1 %v1781_v28, %s1950_s2  ;;  %v1783_v30 = vpop.eup %1782 }
 0xa0c   :  { %v879_v5 = vadd.f32 1.0, %v1783_v30  ;;  %v968_v30 = vunpack.c.h.bf16 %v2188_v17 }
 0xa0e   :  { %1784 = vrcp.f32 %v879_v5  ;;  %v891_v38 = vand.u32 2147483648, %v879_v5  ;;  %vm885_vm4 = vweird.f32 %v879_v5  ;;  %v889_v40 = vand.u32 2147483647, %v879_v5 }
 0xa0f   :  { %1786 = vpow2.f32 %v1609_v49 }
 0xa10   :  { %v892_v43 = vor.u32 1.1754944e-38, %v891_v38  ;;  %vm890_vm6 = vcmp.eq.f32.partialorder %v889_v40, 8.507059e+37 }
 0xa14   :  { %v1785_v31 = vpop.eup %1784 }
 0xa15   :  { %v881_v32 = vmul.f32 %v1785_v31, %v879_v5  ;;  %vm886_vm3 = vweird.f32 %v1785_v31  ;;  %v1787_v50 = vpop.eup %1786 }
 0xa16   :  { %vm887_vm5 = vmor %vm885_vm4, %vm886_vm3  ;;  %v841_v51 = vadd.f32 1.0, %v1787_v50 }
 0xa17   :  { %v882_v34 = vsub.f32 1.0, %v881_v32 }
 0xa18   :  { %1788 = vrcp.f32 %v841_v51  ;;  %v853_v57 = vand.u32 2147483648, %v841_v51  ;;  %vm847_vm8 = vweird.f32 %v841_v51  ;;  %v851_v59 = vand.u32 2147483647, %v841_v51 }
 0xa19   :  { %v883_v35 = vmul.f32 %v1785_v31, %v882_v34 }
 0xa1a   :  { %v854_v61 = vor.u32 1.1754944e-38, %v853_v57  ;;  %vm852_vm11 = vcmp.eq.f32.partialorder %v851_v59, 8.507059e+37 }
 0xa1b   :  { %v884_v37 = vadd.f32 %v1785_v31, %v883_v35 }
 0xa1d   :  { %v888_v42 = vsel %vm887_vm5, %v1785_v31, %v884_v37 }
 0xa1e   :  { %v893_v47 = vsel %vm890_vm6, %v892_v43, %v888_v42  ;;  %v1789_v52 = vpop.eup %1788 }
 0xa1f   :  { %v843_v53 = vmul.f32 %v1789_v52, %v841_v51  ;;  %vm848_vm7 = vweird.f32 %v1789_v52  ;;  %v896_v4 = vmul.f32 %v893_v47, %v2199_v63 }
 0xa20   :  { %vm849_vm10 = vmor %vm847_vm8, %vm848_vm7 }
 0xa21   :  { %v844_v54 = vsub.f32 1.0, %v843_v53 }
 0xa23   :  { %v845_v55 = vmul.f32 %v1789_v52, %v844_v54 }
 0xa25   :  { %v846_v56 = vadd.f32 %v1789_v52, %v845_v55 }
 0xa27   :  { %v850_v60 = vsel %vm849_vm10, %v1789_v52, %v846_v56 }
 0xa28   :  { %v855_v39 = vsel %vm852_vm11, %v854_v61, %v850_v60 }
 0xa29   :  { %v858_v12 = vmul.f32 %v855_v39, %v2204_v3 }
 0xa3c   :  { %v899_v45 = vpop.permute.xlu2 %898 }
 0xa3d   :  { %v901_v36 = vmul.f32 %v899_v45, %v893_v47 }
 0xa3f   :  { %903 = vrot.lane.b32.xlu0 %v901_v36, %s1950_s2 }
 0xa7d   :  { %v861_v0 = vpop.permute.xlu1 %860 }
 0xa7e   :  { %v863_v2 = vmul.f32 %v861_v0, %v855_v39 }
 0xa80   :  { %865 = vrot.lane.b32.xlu2 %v863_v2, %s1950_s2 }
 0xab1   :  { %v904_v6 = vpop.permute.xlu0 %903 }
 0xab2   :  { %v2224_v58 = vadd.f32 %v904_v6, %v896_v4 }
 0xab4   :  { %1790 = vtanh.f32 %v2224_v58 }
 0xaba   :  { %v1791_v8 = vpop.eup %1790 }
 0xabb   :  { %909 = vrot.lane.b32.xlu0 %v1791_v8, %s1950_s2 }
 0xada   :  { %v866_v13 = vpop.permute.xlu2 %865 }
 0xadb   :  { %v2229_v18 = vadd.f32 %v866_v13, %v858_v12 }
 0xadd   :  { %1792 = vtanh.f32 %v2229_v18 }
 0xae3   :  { %v1793_v19 = vpop.eup %1792 }
 0xae4   :  { %871 = vrot.lane.b32.xlu2 %v1793_v19, %s1950_s2 }
 0xb2d   :  { %v910_v20 = vpop.permute.xlu0 %909 }
 0xb2e   :  { %v912_v63 = vmul.f32 %v910_v20, %v893_v47 }
 0xb30   :  { %v2233_v21 = vpack.c.bf16 %v912_v63, %v912_v63 }
 0xb32   :  { %v947_v15 = vunpack.c.l.b16 %v2233_v21 }
 0xb34   :  { %v948_v10 = vpack.c.b16 %v947_v15, %v947_v15 }
 0xb36   :  { %949 = vrot.lane.b32.xlu1 %v948_v10, %s1945_s13 }
 0xb3e   :  { %v872_v16 = vpop.permute.xlu2 %871 }
 0xb3f   :  { %v874_v22 = vmul.f32 %v872_v16, %v855_v39 }
 0xb41   :  { %v2237_v3 = vpack.c.bf16 %v874_v22, %v874_v22 }
 0xb43   :  { %v927_v9 = vunpack.c.l.b16 %v2237_v3 }
 0xb45   :  { %v928_v11 = vpack.c.b16 %v927_v9, %v927_v9 }
 0xb47   :  { %929 = vrot.lane.b32.xlu0 %v928_v11, %s1945_s13 }
 0xba8   :  { %v950_v23 = vpop.permute.xlu1 %949 }
 0xba9   :  { %1612 = vmatmul.msk.bf16.vlgmr.msrb.gmra.mxu3 %vm231_vm9, %v950_v23 }
 0xbb9   :  { %v930_v24 = vpop.permute.xlu0 %929 }
 0xbba   :  { %1611 = vmatmul.msk.bf16.vlgmr.msrb.gmra.mxu2 %vm231_vm9, %v930_v24 }
 0xc2c   :  { %v963_v26 = vpop.f32.mrf.mxu3 }
 0xc2d   :  { %v1009_v27 = vadd.f32 %v970_v25, %v963_v26 }
 0xc2f   :  { %1794 = vtanh.f32 %v1009_v27  ;;  %v1614_v35 = vmul.f32 -1.442695, %v1009_v27 }
 0xc34   :  { %v965_v28 = vpop.f32.mrf.mxu3 }
 0xc35   :  { %v1795_v29 = vpop.eup %1794 }
 0xc36   :  { %1032 = vrot.lane.b32.xlu1 %v1795_v29, %s1950_s2 }
 0xc3d   :  { %v943_v5 = vpop.f32.mrf.mxu2 }
 0xc3e   :  { %v971_v31 = vadd.f32 %v968_v30, %v943_v5  ;;  %v1103_v5 = vld [vmem:[#allocation2 + $0xc] sm:$0xf] }
 0xc40   :  { %1796 = vtanh.f32 %v971_v31  ;;  %v1613_v38 = vmul.f32 -1.442695, %v971_v31  ;;  %v1104_v31 = vunpack.c.l.bf16 %v1103_v5 }
 0xc41   :  { %1798 = vpow2.f32 %v1614_v35 }
 0xc45   :  { %v945_v32 = vpop.f32.mrf.mxu2 }
 0xc46   :  { %v1797_v34 = vpop.eup %1796 }
 0xc47   :  { %994 = vrot.lane.b32.xlu0 %v1797_v34, %s1950_s2  ;;  %v1799_v37 = vpop.eup %1798 }
 0xc48   :  { %v1013_v14 = vadd.f32 1.0, %v1799_v37 }
 0xc4a   :  { %1800 = vrcp.f32 %v1013_v14  ;;  %v1025_v49 = vand.u32 2147483648, %v1013_v14  ;;  %vm1019_vm13 = vweird.f32 %v1013_v14  ;;  %v1023_v51 = vand.u32 2147483647, %v1013_v14 }
 0xc4b   :  { %1802 = vpow2.f32 %v1613_v38 }
 0xc4c   :  { %v1026_v53 = vor.u32 1.1754944e-38, %v1025_v49  ;;  %vm1024_vm15 = vcmp.eq.f32.partialorder %v1023_v51, 8.507059e+37 }
 0xc50   :  { %v1801_v40 = vpop.eup %1800 }
 0xc51   :  { %v1015_v42 = vmul.f32 %v1801_v40, %v1013_v14  ;;  %v1803_v43 = vpop.eup %1802  ;;  %vm1020_vm12 = vweird.f32 %v1801_v40  ;;  %v1101_v14 = vld [vmem:[#allocation2 + $0x30] sm:$0xf] }
 0xc52   :  { %v975_v45 = vadd.f32 1.0, %v1803_v43  ;;  %vm1021_vm14 = vmor %vm1019_vm13, %vm1020_vm12  ;;  %v1102_v38 = vunpack.c.l.bf16 %v1101_v14 }
 0xc53   :  { %v1016_v47 = vsub.f32 1.0, %v1015_v42 }
 0xc54   :  { %1804 = vrcp.f32 %v975_v45  ;;  %v987_v0 = vand.u32 2147483648, %v975_v45  ;;  %vm981_vm2 = vweird.f32 %v975_v45  ;;  %v985_v39 = vand.u32 2147483647, %v975_v45 }
 0xc55   :  { %v1017_v17 = vmul.f32 %v1801_v40, %v1016_v47 }
 0xc56   :  { %v988_v4 = vor.u32 1.1754944e-38, %v987_v0  ;;  %vm986_vm3 = vcmp.eq.f32.partialorder %v985_v39, 8.507059e+37 }
 0xc57   :  { %v1018_v36 = vadd.f32 %v1801_v40, %v1017_v17 }
 0xc59   :  { %v1022_v52 = vsel %vm1021_vm14, %v1801_v40, %v1018_v36 }
 0xc5a   :  { %v1805_v50 = vpop.eup %1804  ;;  %v1027_v56 = vsel %vm1024_vm15, %v1026_v53, %v1022_v52 }
 0xc5b   :  { %v977_v54 = vmul.f32 %v1805_v50, %v975_v45  ;;  %vm982_vm1 = vweird.f32 %v1805_v50  ;;  %v1030_v13 = vmul.f32 %v1027_v56, %v2224_v58 }
 0xc5c   :  { %vm983_vm0 = vmor %vm981_vm2, %vm982_vm1 }
 0xc5d   :  { %v978_v59 = vsub.f32 1.0, %v977_v54 }
 0xc5f   :  { %v979_v60 = vmul.f32 %v1805_v50, %v978_v59 }
 0xc61   :  { %v980_v61 = vadd.f32 %v1805_v50, %v979_v60 }
 0xc63   :  { %v984_v2 = vsel %vm983_vm0, %v1805_v50, %v980_v61 }
 0xc64   :  { %v989_v8 = vsel %vm986_vm3, %v988_v4, %v984_v2 }
 0xc65   :  { %v992_v15 = vmul.f32 %v989_v8, %v2229_v18 }
 0xca8   :  { %v1033_v55 = vpop.permute.xlu1 %1032 }
 0xca9   :  { %v1035_v57 = vmul.f32 %v1033_v55, %v1027_v56 }
 0xcab   :  { %1037 = vrot.lane.b32.xlu2 %v1035_v57, %s1950_s2 }
 0xcb9   :  { %v995_v6 = vpop.permute.xlu0 %994 }
 0xcba   :  { %v997_v12 = vmul.f32 %v995_v6, %v989_v8 }
 0xcbc   :  { %999 = vrot.lane.b32.xlu1 %v997_v12, %s1950_s2 }
 0xd05   :  { %v1038_v19 = vpop.permute.xlu2 %1037 }
 0xd06   :  { %v2250_v20 = vadd.f32 %v1038_v19, %v1030_v13 }
 0xd08   :  { %1806 = vtanh.f32 %v2250_v20 }
 0xd0e   :  { %v1807_v63 = vpop.eup %1806 }
 0xd0f   :  { %1043 = vrot.lane.b32.xlu2 %v1807_v63, %s1950_s2 }
 0xd2e   :  { %v1000_v10 = vpop.permute.xlu1 %999 }
 0xd2f   :  { %v2255_v16 = vadd.f32 %v1000_v10, %v992_v15 }
 0xd31   :  { %1808 = vtanh.f32 %v2255_v16 }
 0xd37   :  { %v1809_v22 = vpop.eup %1808 }
 0xd38   :  { %1005 = vrot.lane.b32.xlu1 %v1809_v22, %s1950_s2 }
 0xd69   :  { %v1044_v9 = vpop.permute.xlu2 %1043 }
 0xd6a   :  { %v1046_v58 = vmul.f32 %v1044_v9, %v1027_v56 }
 0xd6c   :  { %v2259_v11 = vpack.c.bf16 %v1046_v58, %v1046_v58 }
 0xd6e   :  { %v1081_v23 = vunpack.c.l.b16 %v2259_v11 }
 0xd70   :  { %v1082_v24 = vpack.c.b16 %v1081_v23, %v1081_v23 }
 0xd72   :  { %1083 = vrot.lane.b32.xlu0 %v1082_v24, %s1945_s13 }
 0xdaa   :  { %v1006_v25 = vpop.permute.xlu1 %1005 }
 0xdab   :  { %v1008_v26 = vmul.f32 %v1006_v25, %v989_v8 }
 0xdad   :  { %v2263_v18 = vpack.c.bf16 %v1008_v26, %v1008_v26 }
 0xdaf   :  { %v1061_v27 = vunpack.c.l.b16 %v2263_v18 }
 0xdb1   :  { %v1062_v28 = vpack.c.b16 %v1061_v27, %v1061_v27 }
 0xdb3   :  { %1063 = vrot.lane.b32.xlu2 %v1062_v28, %s1945_s13 }
 0xde4   :  { %v1084_v29 = vpop.permute.xlu0 %1083 }
 0xde5   :  { %1616 = vmatmul.msk.bf16.vlgmr.msra.gmra.mxu1 %vm231_vm9, %v1084_v29 }
 0xe0d   :  { %v1064_v30 = vpop.permute.xlu2 %1063 }
 0xe0e   :  { %1615 = vmatmul.msk.bf16.vlgmr.msra.gmra.mxu0 %vm231_vm9, %v1064_v30 }
 0xe62   :  { %v1097_v32 = vpop.f32.mrf.mxu1 }
 0xe63   :  { %v1143_v34 = vadd.f32 %v1104_v31, %v1097_v32 }
 0xe65   :  { %1810 = vtanh.f32 %v1143_v34  ;;  %v1618_v47 = vmul.f32 -1.442695, %v1143_v34 }
 0xe6a   :  { %v1099_v35 = vpop.f32.mrf.mxu1 }
 0xe6b   :  { %v1811_v37 = vpop.eup %1810 }
 0xe6c   :  { %1166 = vrot.lane.b32.xlu0 %v1811_v37, %s1950_s2 }
 0xe8b   :  { %v1077_v40 = vpop.f32.mrf.mxu0 }
 0xe8c   :  { %v1105_v42 = vadd.f32 %v1102_v38, %v1077_v40 }
 0xe8e   :  { %1812 = vtanh.f32 %v1105_v42  ;;  %v1617_v49 = vmul.f32 -1.442695, %v1105_v42 }
 0xe8f   :  { %1814 = vpow2.f32 %v1618_v47 }
 0xe93   :  { %v1079_v43 = vpop.f32.mrf.mxu0 }
 0xe94   :  { %v1813_v45 = vpop.eup %1812  ;;  %v1237_v43 = vld [vmem:[#allocation2 + $0x4] sm:$0xf] }
 0xe95   :  { %1128 = vrot.lane.b32.xlu2 %v1813_v45, %s1950_s2  ;;  %v1815_v17 = vpop.eup %1814  ;;  %v1238_v45 = vunpack.c.l.bf16 %v1237_v43 }
 0xe96   :  { %v1147_v36 = vadd.f32 1.0, %v1815_v17 }
 0xe98   :  { %1816 = vrcp.f32 %v1147_v36  ;;  %v1159_v57 = vand.u32 2147483648, %v1147_v36  ;;  %vm1153_vm5 = vweird.f32 %v1147_v36  ;;  %v1157_v60 = vand.u32 2147483647, %v1147_v36 }
 0xe99   :  { %1818 = vpow2.f32 %v1617_v49 }
 0xe9a   :  { %v1160_v0 = vor.u32 1.1754944e-38, %v1159_v57  ;;  %vm1158_vm7 = vcmp.eq.f32.partialorder %v1157_v60, 8.507059e+37 }
 0xe9e   :  { %v1817_v50 = vpop.eup %1816 }
 0xe9f   :  { %v1149_v51 = vmul.f32 %v1817_v50, %v1147_v36  ;;  %v1819_v52 = vpop.eup %1818  ;;  %vm1154_vm4 = vweird.f32 %v1817_v50 }
 0xea0   :  { %v1109_v53 = vadd.f32 1.0, %v1819_v52  ;;  %vm1155_vm6 = vmor %vm1153_vm5, %vm1154_vm4  ;;  %vm364_vm5 = vcmask 257024  }
 0xea1   :  { %v1150_v54 = vsub.f32 1.0, %v1149_v51 }
 0xea2   :  { %1820 = vrcp.f32 %v1109_v53  ;;  %v1121_v19 = vand.u32 2147483648, %v1109_v53  ;;  %vm1115_vm10 = vweird.f32 %v1109_v53  ;;  %v1119_v63 = vand.u32 2147483647, %v1109_v53 }
 0xea3   :  { %v1151_v55 = vmul.f32 %v1817_v50, %v1150_v54 }
 0xea4   :  { %v1122_v10 = vor.u32 1.1754944e-38, %v1121_v19  ;;  %vm1120_vm12 = vcmp.eq.f32.partialorder %v1119_v63, 8.507059e+37 }
 0xea5   :  { %v1152_v56 = vadd.f32 %v1817_v50, %v1151_v55 }
 0xea7   :  { %v1156_v61 = vsel %vm1155_vm6, %v1817_v50, %v1152_v56  ;;  %v1235_v50 = vld [vmem:[#allocation2 + $0x38] sm:$0xf] }
 0xea8   :  { %v1821_v59 = vpop.eup %1820  ;;  %v1161_v4 = vsel %vm1158_vm7, %v1160_v0, %v1156_v61  ;;  %v1236_v51 = vunpack.c.l.bf16 %v1235_v50 }
 0xea9   :  { %v1111_v39 = vmul.f32 %v1821_v59, %v1109_v53  ;;  %vm1116_vm8 = vweird.f32 %v1821_v59  ;;  %v1164_v23 = vmul.f32 %v1161_v4, %v2250_v20 }
 0xeaa   :  { %vm1117_vm11 = vmor %vm1115_vm10, %vm1116_vm8 }
 0xeab   :  { %v1112_v8 = vsub.f32 1.0, %v1111_v39 }
 0xead   :  { %v1113_v12 = vmul.f32 %v1821_v59, %v1112_v8 }
 0xeaf   :  { %v1114_v13 = vadd.f32 %v1821_v59, %v1113_v12 }
 0xeb1   :  { %v1118_v15 = vsel %vm1117_vm11, %v1821_v59, %v1114_v13 }
 0xeb2   :  { %v1123_v9 = vsel %vm1120_vm12, %v1122_v10, %v1118_v15 }
 0xeb3   :  { %v1126_v27 = vmul.f32 %v1123_v9, %v2255_v16 }
 0xede   :  { %v1167_v2 = vpop.permute.xlu0 %1166 }
 0xedf   :  { %v1169_v6 = vmul.f32 %v1167_v2, %v1161_v4 }
 0xee1   :  { %1171 = vrot.lane.b32.xlu1 %v1169_v6, %s1950_s2 }
 0xeef   :  { %v1129_v22 = vpop.permute.xlu2 %1128 }
 0xef0   :  { %v1131_v58 = vmul.f32 %v1129_v22, %v1123_v9 }
 0xef2   :  { %1133 = vrot.lane.b32.xlu0 %v1131_v58, %s1950_s2 }
 0xf53   :  { %v1172_v24 = vpop.permute.xlu1 %1171 }
 0xf54   :  { %v2274_v25 = vadd.f32 %v1172_v24, %v1164_v23 }
 0xf56   :  { %1822 = vtanh.f32 %v2274_v25 }
 0xf5c   :  { %v1823_v26 = vpop.eup %1822 }
 0xf5d   :  { %1177 = vrot.lane.b32.xlu1 %v1823_v26, %s1950_s2 }
 0xf64   :  { %v1134_v28 = vpop.permute.xlu0 %1133 }
 0xf65   :  { %v2279_v29 = vadd.f32 %v1134_v28, %v1126_v27 }
 0xf67   :  { %1824 = vtanh.f32 %v2279_v29 }
 0xf6d   :  { %v1825_v30 = vpop.eup %1824 }
 0xf6e   :  { %1139 = vrot.lane.b32.xlu0 %v1825_v30, %s1950_s2 }
 0xfcf   :  { %v1178_v5 = vpop.permute.xlu1 %1177 }
 0xfd0   :  { %v1180_v20 = vmul.f32 %v1178_v5, %v1161_v4 }
 0xfd2   :  { %v2283_v31 = vpack.c.bf16 %v1180_v20, %v1180_v20 }
 0xfd4   :  { %v1215_v32 = vunpack.c.l.b16 %v2283_v31 }
 0xfd6   :  { %v1216_v34 = vpack.c.b16 %v1215_v32, %v1215_v32 }
 0xfd8   :  { %1217 = vrot.lane.b32.xlu2 %v1216_v34, %s1945_s13 }
 0xfe0   :  { %v1140_v35 = vpop.permute.xlu0 %1139 }
 0xfe1   :  { %v1142_v37 = vmul.f32 %v1140_v35, %v1123_v9 }
 0xfe3   :  { %v2287_v16 = vpack.c.bf16 %v1142_v37, %v1142_v37 }
 0xfe5   :  { %v1195_v14 = vunpack.c.l.b16 %v2287_v16 }
 0xfe7   :  { %v1196_v38 = vpack.c.b16 %v1195_v14, %v1195_v14 }
 0xfe9   :  { %1197 = vrot.lane.b32.xlu1 %v1196_v38, %s1945_s13 }
0x1032   :  { %v1218_v40 = vpop.permute.xlu2 %1217 }
0x1033   :  { %1620 = vmatmul.msk.bf16.vlgmr.msra.gmra.mxu3 %vm231_vm9, %v1218_v40  ;;  %v1694_v40 = vld [vmem:[#allocation8 + $0x8] sm:$0xff] }
0x1034   :  { %1475 = vmatpush.bf16.msrb.mxu1 %v1694_v40 }
0x105b   :  { %v1198_v42 = vpop.permute.xlu1 %1197 }
0x105c   :  { %1619 = vmatmul.msk.bf16.vlgmr.msra.gmra.mxu2 %vm231_vm9, %v1198_v42  ;;  %v1693_v42 = vld [vmem:[#allocation8] sm:$0xff] }
0x105d   :  { %1476 = vmatpush.bf16.msrb.mxu1 %v1693_v42 }
0x10b6   :  { %v1231_v47 = vpop.f32.mrf.mxu3 }
0x10b7   :  { %v1277_v17 = vadd.f32 %v1238_v45, %v1231_v47 }
0x10b9   :  { %1826 = vtanh.f32 %v1277_v17  ;;  %v1622_v56 = vmul.f32 -1.442695, %v1277_v17 }
0x10be   :  { %v1233_v36 = vpop.f32.mrf.mxu3 }
0x10bf   :  { %v1827_v49 = vpop.eup %1826 }
0x10c0   :  { %1300 = vrot.lane.b32.xlu2 %v1827_v49, %s1950_s2 }
0x10df   :  { %v1211_v52 = vpop.f32.mrf.mxu2 }
0x10e0   :  { %v1239_v53 = vadd.f32 %v1236_v51, %v1211_v52  ;;  %v1700_v51 = vld [vmem:[#allocation10 + $0x8] sm:$0xff]  ;;  %v1699_v52 = vld [vmem:[#allocation10] sm:$0xff] }
0x10e1   :  { %1402 = vmatpush.bf16.msrb.mxu0 %v1700_v51 }
0x10e2   :  { %1828 = vtanh.f32 %v1239_v53 }
0x10e3   :  { %1830 = vpow2.f32 %v1622_v56 }
0x10e5   :  { %1403 = vmatpush.bf16.msrb.mxu0 %v1699_v52 }
0x10e7   :  { %v1213_v54 = vpop.f32.mrf.mxu2 }
0x10e8   :  { %v1829_v55 = vpop.eup %1828 }
0x10e9   :  { %1262 = vrot.lane.b32.xlu1 %v1829_v55, %s1950_s2  ;;  %v1831_v57 = vpop.eup %1830 }
0x10ea   :  { %v1281_v59 = vadd.f32 1.0, %v1831_v57 }
0x10ec   :  { %1832 = vrcp.f32 %v1281_v59  ;;  %v1293_v4 = vand.u32 2147483648, %v1281_v59  ;;  %vm1287_vm14 = vweird.f32 %v1281_v59  ;;  %v1291_v6 = vand.u32 2147483647, %v1281_v59 }
0x10ee   :  { %v1294_v12 = vor.u32 1.1754944e-38, %v1293_v4  ;;  %vm1292_vm1 = vcmp.eq.f32.partialorder %v1291_v6, 8.507059e+37  ;;  %v1713_v6 = vld [vmem:[%s2368_s7] ss:$0 sm:$0xff]  ;;  %s1951_s7 = smov [#allocation11]  }
0x10ef   :  { %s1522_s18 = sshll.u32 %s1951_s7, 4  ;;  %s1523_s18 = int_to_ptr.vmem [resolvable:$true] %s1522_s18 }
0x10f1   :  { %361 = vrot.lane.b32.xlu1 %v2110_v46, %s1945_s13  ;;  %v1621_v46 = vmul.f32 -1.442695, %v1239_v53 }
0x10f2   :  { %v1833_v60 = vpop.eup %1832 }
0x10f3   :  { %v1283_v61 = vmul.f32 %v1833_v60, %v1281_v59  ;;  %vm1288_vm13 = vweird.f32 %v1833_v60  ;;  %1834 = vpow2.f32 %v1621_v46 }
0x10f4   :  { %vm1289_vm15 = vmor %vm1287_vm14, %vm1288_vm13 }
0x10f5   :  { %v1284_v0 = vsub.f32 1.0, %v1283_v61 }
0x10f7   :  { %v1285_v39 = vmul.f32 %v1833_v60, %v1284_v0 }
0x10f9   :  { %v1286_v2 = vadd.f32 %v1833_v60, %v1285_v39  ;;  %v1835_v15 = vpop.eup %1834 }
0x10fa   :  { %v1243_v10 = vadd.f32 1.0, %v1835_v15 }
0x10fb   :  { %v1290_v8 = vsel %vm1289_vm15, %v1833_v60, %v1286_v2 }
0x10fc   :  { %v1295_v19 = vsel %vm1292_vm1, %v1294_v12, %v1290_v8  ;;  %1836 = vrcp.f32 %v1243_v10  ;;  %v1255_v26 = vand.u32 2147483648, %v1243_v10  ;;  %vm1249_vm0 = vweird.f32 %v1243_v10 }
0x10fd   :  { %v1253_v27 = vand.u32 2147483647, %v1243_v10  ;;  %v1298_v35 = vmul.f32 %v1295_v19, %v2274_v25 }
0x10fe   :  { %v1256_v30 = vor.u32 1.1754944e-38, %v1255_v26 }
0x10ff   :  { %vm1254_vm4 = vcmp.eq.f32.partialorder %v1253_v27, 8.507059e+37 }
0x1102   :  { %v1837_v22 = vpop.eup %1836 }
0x1103   :  { %v1245_v9 = vmul.f32 %v1837_v22, %v1243_v10  ;;  %vm1250_vm2 = vweird.f32 %v1837_v22 }
0x1104   :  { %vm1251_vm3 = vmor %vm1249_vm0, %vm1250_vm2 }
0x1105   :  { %v1246_v58 = vsub.f32 1.0, %v1245_v9 }
0x1107   :  { %v1247_v23 = vmul.f32 %v1837_v22, %v1246_v58 }
0x1109   :  { %v1248_v24 = vadd.f32 %v1837_v22, %v1247_v23 }
0x110b   :  { %v1252_v28 = vsel %vm1251_vm3, %v1837_v22, %v1248_v24 }
0x110c   :  { %v1257_v20 = vsel %vm1254_vm4, %v1256_v30, %v1252_v28 }
0x111a   :  { %v1301_v13 = vpop.permute.xlu2 %1300 }
0x111b   :  { %v1303_v63 = vmul.f32 %v1301_v13, %v1295_v19 }
0x111d   :  { %1305 = vrot.lane.b32.xlu0 %v1303_v63, %s1950_s2 }
0x115b   :  { %v1263_v5 = vpop.permute.xlu1 %1262 }
0x115c   :  { %v1265_v32 = vmul.f32 %v1263_v5, %v1257_v20 }
0x115e   :  { %1267 = vrot.lane.b32.xlu2 %v1265_v32, %s1950_s2 }
0x1163   :  { %v362_v34 = vpop.permute.xlu1 %361 }
0x1164   :  { %365 = vst.msk [vmem:[#allocation3] sm:$0xf] %vm364_vm5, %v362_v34 }
0x1166   :  { %501 = vrot.lane.b32.xlu2 %v2138_v33, %s1945_s13  ;;  %v1260_v33 = vmul.f32 %v1257_v20, %v2279_v29 }
0x118f   :  { %v1306_v37 = vpop.permute.xlu0 %1305 }
0x1190   :  { %v1308_v14 = vadd.f32 %v1306_v37, %v1298_v35 }
0x1192   :  { %1838 = vtanh.f32 %v1308_v14 }
0x1198   :  { %v1839_v38 = vpop.eup %1838 }
0x1199   :  { %1311 = vrot.lane.b32.xlu0 %v1839_v38, %s1950_s2 }
0x11a1   :  { %1190 = vrot.lane.b32.xlu0 %v2283_v31, %s1945_s13 }
0x11a9   :  { %641 = vrot.lane.b32.xlu0 %v2178_v44, %s1945_s13 }
0x11b1   :  { %1056 = vrot.lane.b32.xlu0 %v2259_v11, %s1945_s13 }
0x11b8   :  { %v1268_v25 = vpop.permute.xlu2 %1267 }
0x11b9   :  { %915 = vrot.lane.b32.xlu0 %v2237_v3, %s1945_s13  ;;  %v1270_v43 = vadd.f32 %v1268_v25, %v1260_v33 }
0x11bb   :  { %1840 = vtanh.f32 %v1270_v43 }
0x11c0   :  { %v502_v45 = vpop.permute.xlu2 %501 }
0x11c1   :  { %v1841_v31 = vpop.eup %1840  ;;  %508 = vrot.lane.b32.xlu0 %v2134_v48, %s1945_s13  ;;  %505 = vst.msk [vmem:[#allocation3 + $0x4] sm:$0xf] %vm364_vm5, %v502_v45 }
0x11c2   :  { %1273 = vrot.lane.b32.xlu2 %v1841_v31, %s1950_s2 }
0x11c8   :  { %v1689_v44 = vld [vmem:[#allocation3] sm:$0xff] }
0x11c9   :  { %1675 = vmatmul.msk.bf16.vlgmr.msrb.gmra.mxu1 %vm231_vm9, %v1689_v44 }
0x11ca   :  { %922 = vrot.lane.b32.xlu2 %v2233_v21, %s1945_s13 }
0x11d2   :  { %788 = vrot.lane.b32.xlu2 %v2208_v7, %s1945_s13 }
0x11da   :  { %368 = vrot.lane.b32.xlu2 %v2106_v41, %s1945_s13 }
0x120b   :  { %v1312_v3 = vpop.permute.xlu0 %1311 }
0x120c   :  { %v1314_v11 = vmul.f32 %v1312_v3, %v1295_v19 }
0x120e   :  { %v1322_v29 = vpack.c.bf16 %v1314_v11, %v1314_v11 }
0x1210   :  { %1324 = vrot.lane.b32.xlu1 %v1322_v29, %s1945_s13 }
0x1213   :  { %v1191_v48 = vpop.permute.xlu0 %1190 }
0x1214   :  { %1194 = vst.msk [vmem:[#allocation4 + $0x4] sm:$0xf] %vm364_vm5, %v1191_v48 }
0x1218   :  { %781 = vrot.lane.b32.xlu1 %v2212_v62, %s1945_s13 }
0x121b   :  { %v642_v21 = vpop.permute.xlu0 %641 }
0x121c   :  { %645 = vst.msk [vmem:[#allocation3 + $0x8] sm:$0xf] %vm364_vm5, %v642_v21  ;;  %v1274_v47 = vpop.permute.xlu2 %1273 }
0x121d   :  { %v1276_v17 = vmul.f32 %v1274_v47, %v1257_v20 }
0x121f   :  { %v1315_v7 = vpack.c.bf16 %v1276_v17, %v1276_v17 }
0x1220   :  { %648 = vrot.lane.b32.xlu1 %v2174_v1, %s1945_s13 }
0x1221   :  { %1317 = vrot.lane.b32.xlu2 %v1315_v7, %s1945_s13 }
0x1223   :  { %v1057_v41 = vpop.permute.xlu0 %1056 }
0x1224   :  { %1060 = vst.msk [vmem:[#allocation4 + $0x8] sm:$0xf] %vm364_vm5, %v1057_v41  ;;  %v923_v36 = vpop.permute.xlu2 %922 }
0x1225   :  { %926 = vst.msk [vmem:[#allocation4 + $0xc] sm:$0xf] %vm364_vm5, %v923_v36 }
0x1228   :  { %1049 = vrot.lane.b32.xlu1 %v2263_v18, %s1945_s13 }
0x122b   :  { %v916_v62 = vpop.permute.xlu0 %915 }
0x122c   :  { %919 = vst.msk [vmem:[#allocation3 + $0x10] sm:$0xf] %vm364_vm5, %v916_v62  ;;  %v789_v49 = vpop.permute.xlu2 %788  ;;  %v1696_v59 = vld [vmem:[#allocation4 + $0x8] sm:$0xff] }
0x122d   :  { %792 = vst.msk [vmem:[#allocation4 + $0x10] sm:$0xf] %vm364_vm5, %v789_v49 }
0x1230   :  { %1183 = vrot.lane.b32.xlu1 %v2287_v16, %s1945_s13 }
0x1233   :  { %v509_v1 = vpop.permute.xlu0 %508 }
0x1234   :  { %512 = vst.msk [vmem:[#allocation4 + $0x18] sm:$0xf] %vm364_vm5, %v509_v1  ;;  %v369_v50 = vpop.permute.xlu2 %368 }
0x1235   :  { %372 = vst.msk [vmem:[#allocation4 + $0x1c] sm:$0xf] %vm364_vm5, %v369_v50 }
0x123c   :  { %v1698_v2 = vld [vmem:[#allocation4 + $0x18] sm:$0xff] }
0x1246   :  { %v1478_v4 = vpop.f32.mrf.mxu1 }
0x124e   :  { %v1480_v8 = vpop.f32.mrf.mxu1 }
0x127b   :  { %v1318_v18 = vpop.permute.xlu2 %1317 }
0x127c   :  { %1321 = vst.msk [vmem:[#allocation3 + $0x1c] sm:$0xf] %vm364_vm5, %v1318_v18 }
0x1282   :  { %v1325_v53 = vpop.permute.xlu1 %1324 }
0x1283   :  { %1327 = vst.msk [vmem:[#allocation4] sm:$0xf] %vm364_vm5, %v1325_v53 }
0x128a   :  { %v782_v54 = vpop.permute.xlu1 %781  ;;  %v1695_v55 = vld [vmem:[#allocation4] sm:$0xff] }
0x128b   :  { %785 = vst.msk [vmem:[#allocation3 + $0xc] sm:$0xf] %vm364_vm5, %v782_v54  ;;  %1647 = vmatmul.msk.bf16.vlgmr.msrb.gmra.mxu0 %vm231_vm9, %v1695_v55 }
0x1292   :  { %v649_v16 = vpop.permute.xlu1 %648  ;;  %v1690_v56 = vld [vmem:[#allocation3 + $0x8] sm:$0xff] }
0x1293   :  { %652 = vst.msk [vmem:[#allocation4 + $0x14] sm:$0xf] %vm364_vm5, %v649_v16  ;;  %1676 = vmatmul.msk.bf16.gmra.mxu1 %vm231_vm9, %v1690_v56 }
0x129a   :  { %v1050_v57 = vpop.permute.xlu1 %1049  ;;  %v1697_v0 = vld [vmem:[#allocation4 + $0x10] sm:$0xff] }
0x129b   :  { %1053 = vst.msk [vmem:[#allocation3 + $0x14] sm:$0xf] %vm364_vm5, %v1050_v57  ;;  %1648 = vmatmul.msk.bf16.gmra.mxu0 %vm231_vm9, %v1696_v59 }
0x12a2   :  { %v1184_v60 = vpop.permute.xlu1 %1183  ;;  %v1691_v61 = vld [vmem:[#allocation3 + $0x10] sm:$0xff] }
0x12a3   :  { %1187 = vst.msk [vmem:[#allocation3 + $0x18] sm:$0xf] %vm364_vm5, %v1184_v60  ;;  %1677 = vmatmul.msk.bf16.gmra.mxu1 %vm231_vm9, %v1691_v61 }
0x12aa   :  { %v1692_v39 = vld [vmem:[#allocation3 + $0x18] sm:$0xff] }
0x12ab   :  { %1649 = vmatmul.msk.bf16.gmra.mxu0 %vm231_vm9, %v1697_v0 }
0x12b3   :  { %1678 = vmatmul.msk.bf16.gmra.mxu1 %vm231_vm9, %v1692_v39 }
0x12bb   :  { %1650 = vmatmul.msk.bf16.gmra.mxu0 %vm231_vm9, %v1698_v2 }
0x1308   :  { %v1405_v12 = vpop.f32.mrf.mxu0 }
0x1309   :  { %v1479_v13 = vadd.f32 %v1478_v4, %v1405_v12 }
0x130b   :  { %v1502_v19 = vadd.f32 %v1713_v6, %v1479_v13 }
0x130d   :  { %1510 = vst [vmem:[#allocation11] sm:$0xff] %v1502_v19 }
0x1310   :  { %v1407_v63 = vpop.f32.mrf.mxu0  ;;  %v1483_v46 = vpop.f32.mrf.mxu1 }
0x1311   :  { %v1481_v15 = vadd.f32 %v1480_v8, %v1407_v63 }
0x1313   :  { %v1503_v10 = vadd.f32 %v1713_v6, %v1481_v15 }
0x1315   :  { %1511 = vst [vmem:[#allocation11 + $0x8] sm:$0xff] %v1503_v10 }
0x1318   :  { %v1410_v22 = vpop.f32.mrf.mxu0  ;;  %v1485_v9 = vpop.f32.mrf.mxu1 }
0x1319   :  { %v1484_v58 = vadd.f32 %v1483_v46, %v1410_v22 }
0x131b   :  { %v1504_v23 = vadd.f32 %v1713_v6, %v1484_v58 }
0x131d   :  { %1512 = vst [vmem:[#allocation11 + $0x10] sm:$0xff] %v1504_v23 }
0x1320   :  { %v1412_v24 = vpop.f32.mrf.mxu0  ;;  %v1488_v27 = vpop.f32.mrf.mxu1 }
0x1321   :  { %v1486_v26 = vadd.f32 %v1485_v9, %v1412_v24 }
0x1323   :  { %v1505_v28 = vadd.f32 %v1713_v6, %v1486_v26 }
0x1325   :  { %1513 = vst [vmem:[#allocation11 + $0x18] sm:$0xff] %v1505_v28 }
0x1328   :  { %v1415_v30 = vpop.f32.mrf.mxu0  ;;  %v1490_v32 = vpop.f32.mrf.mxu1 }
0x1329   :  { %v1489_v5 = vadd.f32 %v1488_v27, %v1415_v30 }
0x132b   :  { %v1506_v20 = vadd.f32 %v1713_v6, %v1489_v5 }
0x132d   :  { %1514 = vst [vmem:[#allocation11 + $0x20] sm:$0xff] %v1506_v20 }
0x1330   :  { %v1417_v34 = vpop.f32.mrf.mxu0  ;;  %v1493_v14 = vpop.f32.mrf.mxu1 }
0x1331   :  { %v1491_v35 = vadd.f32 %v1490_v32, %v1417_v34 }
0x1333   :  { %v1507_v37 = vadd.f32 %v1713_v6, %v1491_v35 }
0x1335   :  { %1515 = vst [vmem:[#allocation11 + $0x28] sm:$0xff] %v1507_v37 }
0x1338   :  { %v1420_v38 = vpop.f32.mrf.mxu0  ;;  %v1495_v33 = vpop.f32.mrf.mxu1 }
0x1339   :  { %v1494_v40 = vadd.f32 %v1493_v14, %v1420_v38 }
0x133b   :  { %v1508_v42 = vadd.f32 %v1713_v6, %v1494_v40 }
0x133d   :  { %1516 = vst [vmem:[#allocation11 + $0x30] sm:$0xff] %v1508_v42 }
0x1340   :  { %v1422_v25 = vpop.f32.mrf.mxu0 }
0x1341   :  { %v1496_v43 = vadd.f32 %v1495_v33, %v1422_v25 }
0x1343   :  { %v1509_v45 = vadd.f32 %v1713_v6, %v1496_v43 }
0x1345   :  { %1517 = vst [vmem:[#allocation11 + $0x38] sm:$0xff] %v1509_v45 }
0x1346   :  { %1530 = dma.vmem_to_hbm [thread:$0]  %s1523_s18, 1024, %s1525_s20, [#allocation7], %s1952_s4, %s1952_s4, %s1953_s21  }
0x1347   :  { %1942 = dma.done.wait [#allocation7], 1024  }
0x1348   :  { %1943 = vsyncadd [#allocation7], 4294966272 }
0x1349   :  { %1535 = vsyncpa [#allocation6], 1 }
0x134a   :  { %1536 = vsyncpa [#allocation9], 1 }
0x134b   :  { %1537 = vsyncpa [#allocation7], 1 }

</bundles_post_ra>
